<compile_context>
chip_gen: v7x
topology: tpu7x:2x2x1
jax: 0.10.0
libtpu: 0.0.40
codegen_flags: <defaults>
</compile_context>

<pallas_src>
import functools

import jax
import jax.numpy as jnp
from jax import lax
from jax.experimental import pallas as pl
from jax.experimental.pallas import tpu as pltpu


def _layer_norm(x, gamma, beta, eps=1e-6):
    mean = jnp.mean(x, axis=-1, keepdims=True)
    var = jnp.mean((x - mean) ** 2, axis=-1, keepdims=True)
    return (x - mean) * lax.rsqrt(var + eps) * gamma + beta


def _transformer_block_kernel(n_heads, compute_dtype,
                              x_ref, mask_ref,
                              wqkv_ref, woh_ref,
                              w1_ref, b1_ref, w2_ref, b2_ref,
                              g1_ref, be1_ref, g2_ref, be2_ref,
                              out_ref):
    bt, s, _ = mask_ref.shape          # batch-tile size, seq len
    rows, d = x_ref.shape              # rows == bt * s
    nh = n_heads
    d_k = d // nh

    x = x_ref[...]                     # [rows, D] f32 (residual path stays f32)
    xc = x.astype(compute_dtype)

    # --- fused QKV projection (1/sqrt(d_k) already folded into Q weights) ---
    qkv = jnp.dot(xc, wqkv_ref[...], preferred_element_type=jnp.float32)
    q = qkv[:, 0 * d:1 * d]
    k = qkv[:, 1 * d:2 * d]
    v = qkv[:, 2 * d:3 * d]

    # --- head split: [rows, D] -> [nh*bt, S, d_k] (nh lane slices, one stack)
    def to_heads(t):
        th = jnp.stack([t[:, j * d_k:(j + 1) * d_k] for j in range(nh)], axis=0)
        return th.reshape(nh * bt, s, d_k).astype(compute_dtype)

    qh, kh, vh = to_heads(q), to_heads(k), to_heads(v)

    # --- head-batched attention ---------------------------------------------
    scores = jnp.einsum('gqd,gkd->gqk', qh, kh,
                        preferred_element_type=jnp.float32)      # [nh*bt, S, S]
    if bt == 1:
        scores = scores + mask_ref[...]                          # [1,S,S] bcast
    else:
        scores = (scores.reshape(nh, bt, s, s)
                  + mask_ref[...][None, :, :, :]).reshape(nh * bt, s, s)

    m = jnp.max(scores, axis=-1, keepdims=True)
    e = jnp.exp(scores - m)
    denom = jnp.sum(e, axis=-1, keepdims=True)
    # (e @ V) / sum(e) == softmax(scores) @ V : normalise after the matmul so
    # the normalised probability tensor is never materialised.
    # TODO(synk): nn.Dropout on p_attn / projections is identity (eval mode).
    ctx = jnp.einsum('gqk,gkd->gqd', e.astype(compute_dtype), vh,
                     preferred_element_type=jnp.float32)         # [nh*bt, S, d_k]
    ctx = ctx * pl.reciprocal(denom, approx=True)

    # --- output projection: per-head MXU accumulation (no lane concat) ------
    ctx3 = ctx.reshape(nh, rows, d_k)
    woh = woh_ref[...]                                           # [nh, d_k, D]
    attn_out = jnp.dot(ctx3[0].astype(compute_dtype), woh[0],
                       preferred_element_type=jnp.float32)
    for j in range(1, nh):
        attn_out = attn_out + jnp.dot(ctx3[j].astype(compute_dtype), woh[j],
                                      preferred_element_type=jnp.float32)

    # --- attention residual + LayerNorm (eps=1e-6) ---------------------------
    y = _layer_norm(x + attn_out, g1_ref[...], be1_ref[...])

    # --- position-wise feed-forward + residual + LayerNorm -------------------
    h1 = jnp.dot(y.astype(compute_dtype), w1_ref[...],
                 preferred_element_type=jnp.float32) + b1_ref[...]
    h1 = jnp.maximum(h1, 0.0).astype(compute_dtype)   # cast early, one live copy
    ffn = jnp.dot(h1, w2_ref[...],
                  preferred_element_type=jnp.float32) + b2_ref[...]
    out_ref[...] = _layer_norm(y + ffn, g2_ref[...],
                               be2_ref[...]).astype(out_ref.dtype)


def _vmem_limit_bytes():
    """Per-generation VMEM budget: never request the full physical VMEM
    (v7x has only 64 MiB/TC); use the headroom on 128 MiB parts (v5e/v6e)."""
    try:
        phys = int(pltpu.get_tpu_info().vmem_capacity_bytes)
    except Exception:
        phys = 64 * 1024 * 1024
    return max(32 * 1024 * 1024,
               min(phys - 16 * 1024 * 1024, 112 * 1024 * 1024))


def _pick_block_b(B, S, target_rows):
    """Batch tile: divisor of B with rows = block_b*S obeying the (8,128)
    sublane rule, rows <= target_rows when possible, and >= 2 grid steps when
    possible (so both v7x TensorCores get work)."""
    divisors = [c for c in range(1, B + 1) if B % c == 0]
    tileable = [c for c in divisors if (c * S) % 8 == 0 or c == B]
    fits = [c for c in tileable if c * S <= max(target_rows, S)] or tileable
    multi = [c for c in fits if B // c >= 2]
    return max(multi) if multi else max(fits)


def transformer_block(x, mask, params, *, n_heads, block_b=None,
                      compute_dtype=jnp.bfloat16, out_dtype=jnp.float32):
    B, S, D = x.shape
    assert D % n_heads == 0
    d_k = D // n_heads
    d_inner = params["w1"].shape[1]

    vmem_limit = _vmem_limit_bytes()
    # Larger row slabs on 128 MiB parts (amortise per-step overhead), smaller
    # on v7x's 64 MiB.
    target_rows = 1024 if vmem_limit > 64 * 1024 * 1024 else 512
    if block_b is None:
        block_b = _pick_block_b(B, S, target_rows)
    assert B % block_b == 0
    rows = block_b * S
    grid = (B // block_b,)

    # Layout plumbing done in the wrapper (free in XLA): lane-dense 2-D slab.
    x2d = x.reshape(B * S, D).astype(jnp.float32)
    mask_f32 = mask.astype(jnp.float32)

    # Weight prep: fused QKV with the 1/sqrt(d_k) scale folded into Q, wo split
    # per head; matmul weights in compute dtype, LN/bias params stay f32.
    scale = 1.0 / (d_k ** 0.5)
    wqkv = jnp.concatenate([params["wq"] * scale, params["wk"], params["wv"]],
                           axis=1).astype(compute_dtype)          # [D, 3D]
    woh = params["wo"].reshape(n_heads, d_k, D).astype(compute_dtype)
    w1 = params["w1"].astype(compute_dtype)
    w2 = params["w2"].astype(compute_dtype)

    kernel = functools.partial(_transformer_block_kernel, n_heads, compute_dtype)

    def call(single_buffer_consts):
        def const_spec(shape):
            nd = len(shape)
            idx = lambda i, _nd=nd: (0,) * _nd
            if single_buffer_consts:
                # Grid-invariant operands: no double-buffering (saves VMEM).
                return pl.BlockSpec(shape, idx, pipeline_mode=pl.Buffered(1))
            return pl.BlockSpec(shape, idx)

        in_specs = [
            pl.BlockSpec((rows, D), lambda i: (i, 0)),            # x rows
            pl.BlockSpec((block_b, S, S), lambda i: (i, 0, 0)),   # additive mask
            const_spec((D, 3 * D)),                               # wqkv
            const_spec((n_heads, d_k, D)),                        # wo per head
            const_spec((D, d_inner)),                             # w1
            const_spec((1, d_inner)),                             # b1
            const_spec((d_inner, D)),                             # w2
            const_spec((1, D)),                                   # b2
            const_spec((1, D)),                                   # ln1 gamma
            const_spec((1, D)),                                   # ln1 beta
            const_spec((1, D)),                                   # ln2 gamma
            const_spec((1, D)),                                   # ln2 beta
        ]
        out = pl.pallas_call(
            kernel,
            out_shape=jax.ShapeDtypeStruct((B * S, D), out_dtype),
            grid_spec=pltpu.PrefetchScalarGridSpec(
                num_scalar_prefetch=0,
                grid=grid,
                in_specs=in_specs,
                out_specs=pl.BlockSpec((rows, D), lambda i: (i, 0)),
            ),
            compiler_params=pltpu.CompilerParams(
                dimension_semantics=("parallel",),
                vmem_limit_bytes=vmem_limit),
        )(x2d, mask_f32, wqkv, woh, w1, params["b1"], w2, params["b2"],
          params["g1"], params["be1"], params["g2"], params["be2"])
        return jax.block_until_ready(out)

    try:
        out2d = call(True)
    except Exception:
        # Fallback if pl.Buffered(1) single-buffering is not supported.
        out2d = call(False)
    return out2d.reshape(B, S, D)


def transformer_block_reference(x, mask, params, *, n_heads):
    """Pure-JAX f32 reference reproducing the PyTorch forward (dropout = identity)."""
    B, S, D = x.shape
    d_k = D // n_heads

    def ln(v, g, b):
        mu = jnp.mean(v, axis=-1, keepdims=True)
        var = jnp.mean((v - mu) ** 2, axis=-1, keepdims=True)
        return (v - mu) / jnp.sqrt(var + 1e-6) * g + b

    q = (x @ params["wq"]).reshape(B, S, n_heads, d_k).transpose(0, 2, 1, 3)
    k = (x @ params["wk"]).reshape(B, S, n_heads, d_k).transpose(0, 2, 1, 3)
    v = (x @ params["wv"]).reshape(B, S, n_heads, d_k).transpose(0, 2, 1, 3)
    scores = jnp.einsum("bhqd,bhkd->bhqk", q, k) / (d_k ** 0.5)
    scores = scores + mask[:, None, :, :]
    p = jax.nn.softmax(scores, axis=-1)
    ctx = jnp.einsum("bhqk,bhkd->bhqd", p, v).transpose(0, 2, 1, 3).reshape(B, S, D)
    y = ln(x + ctx @ params["wo"], params["g1"][0], params["be1"][0])
    h = jax.nn.relu(y @ params["w1"] + params["b1"][0])
    ffn = h @ params["w2"] + params["b2"][0]
    return ln(y + ffn, params["g2"][0], params["be2"][0])


if __name__ == "__main__":
    B, S, D, H, D_INNER = 2, 8, 32, 4, 64

    key = jax.random.PRNGKey(0)
    ks = jax.random.split(key, 14)

    params = {
        "wq": 0.1 * jax.random.normal(ks[0], (D, D), jnp.float32),
        "wk": 0.1 * jax.random.normal(ks[1], (D, D), jnp.float32),
        "wv": 0.1 * jax.random.normal(ks[2], (D, D), jnp.float32),
        "wo": 0.1 * jax.random.normal(ks[3], (D, D), jnp.float32),
        "w1": 0.1 * jax.random.normal(ks[4], (D, D_INNER), jnp.float32),
        "b1": 0.1 * jax.random.normal(ks[5], (1, D_INNER), jnp.float32),
        "w2": 0.1 * jax.random.normal(ks[6], (D_INNER, D), jnp.float32),
        "b2": 0.1 * jax.random.normal(ks[7], (1, D), jnp.float32),
        "g1": 1.0 + 0.1 * jax.random.normal(ks[8], (1, D), jnp.float32),
        "be1": 0.1 * jax.random.normal(ks[9], (1, D), jnp.float32),
        "g2": 1.0 + 0.1 * jax.random.normal(ks[10], (1, D), jnp.float32),
        "be2": 0.1 * jax.random.normal(ks[11], (1, D), jnp.float32),
    }

    x = jax.random.normal(ks[12], (B, S, D), jnp.float32)
    # Additive causal mask (0 where attended, -1e9 where masked), broadcast over heads.
    row = jnp.arange(S)[:, None]
    col = jnp.arange(S)[None, :]
    mask = jnp.where(col <= row, 0.0, -1e9).astype(jnp.float32)
    mask = jnp.broadcast_to(mask, (B, S, S))

    ref = transformer_block_reference(x, mask, params, n_heads=H)

    # f32 compute path: tight semantic check (tolerance covers the approximate
    # EUP reciprocal used for the softmax normalisation).
    out_f32 = transformer_block(x, mask, params, n_heads=H,
                                compute_dtype=jnp.float32)
    out_f32 = jax.block_until_ready(out_f32)
    assert out_f32.shape == (B, S, D)
    assert jnp.allclose(out_f32, ref, atol=1e-2, rtol=1e-2), \
        "f32 kernel/reference mismatch"

    # bf16 compute path (the fast path): bf16 matmul inputs + f32 accumulation.
    out_bf16 = transformer_block(x, mask, params, n_heads=H,
                                 compute_dtype=jnp.bfloat16)
    out_bf16 = jax.block_until_ready(out_bf16)
    assert out_bf16.shape == (B, S, D)
    assert jnp.allclose(out_bf16, ref, atol=6e-2, rtol=6e-2), \
        "bf16 kernel/reference mismatch"

    print("KERNEL_OK")
</pallas_src>

<mosaic_0001>
module attributes {stable_mosaic.version = 11 : i64} {
  func.func @_transformer_block_kernel(%arg0: i32, %arg1: memref<8x32xf32, #tpu.memory_space<vmem>>, %arg2: memref<1x8x8xf32, #tpu.memory_space<vmem>>, %arg3: memref<32x96xf32, #tpu.memory_space<vmem>>, %arg4: memref<4x8x32xf32, #tpu.memory_space<vmem>>, %arg5: memref<32x64xf32, #tpu.memory_space<vmem>>, %arg6: memref<1x64xf32, #tpu.memory_space<vmem>>, %arg7: memref<64x32xf32, #tpu.memory_space<vmem>>, %arg8: memref<1x32xf32, #tpu.memory_space<vmem>>, %arg9: memref<1x32xf32, #tpu.memory_space<vmem>>, %arg10: memref<1x32xf32, #tpu.memory_space<vmem>>, %arg11: memref<1x32xf32, #tpu.memory_space<vmem>>, %arg12: memref<1x32xf32, #tpu.memory_space<vmem>>, %arg13: memref<8x32xf32, #tpu.memory_space<vmem>>) attributes {dimension_semantics = [#tpu.dimension_semantics<parallel>], iteration_bounds = array<i64: 2>, scalar_prefetch = 0 : i64, scratch_operands = 0 : i64, tpu.core_type = #tpu.core_type<tc>, window_params = [{transform_indices = @transform_0, window_bounds = array<i64: 8, 32>}, {transform_indices = @transform_1, window_bounds = array<i64: 1, 8, 8>}, {pipeline_mode = #tpu.pipeline_mode<synchronous>, transform_indices = @transform_2, window_bounds = array<i64: 32, 96>}, {pipeline_mode = #tpu.pipeline_mode<synchronous>, transform_indices = @transform_3, window_bounds = array<i64: 4, 8, 32>}, {pipeline_mode = #tpu.pipeline_mode<synchronous>, transform_indices = @transform_4, window_bounds = array<i64: 32, 64>}, {pipeline_mode = #tpu.pipeline_mode<synchronous>, transform_indices = @transform_5, window_bounds = array<i64: 1, 64>}, {pipeline_mode = #tpu.pipeline_mode<synchronous>, transform_indices = @transform_6, window_bounds = array<i64: 64, 32>}, {pipeline_mode = #tpu.pipeline_mode<synchronous>, transform_indices = @transform_7, window_bounds = array<i64: 1, 32>}, {pipeline_mode = #tpu.pipeline_mode<synchronous>, transform_indices = @transform_8, window_bounds = array<i64: 1, 32>}, {pipeline_mode = #tpu.pipeline_mode<synchronous>, transform_indices = @transform_9, window_bounds = array<i64: 1, 32>}, {pipeline_mode = #tpu.pipeline_mode<synchronous>, transform_indices = @transform_10, window_bounds = array<i64: 1, 32>}, {pipeline_mode = #tpu.pipeline_mode<synchronous>, transform_indices = @transform_11, window_bounds = array<i64: 1, 32>}, {transform_indices = @transform_12, window_bounds = array<i64: 8, 32>}]} {
    %c0 = arith.constant 0 : index
    %c0_0 = arith.constant 0 : index
    %0 = vector.load %arg1[%c0, %c0_0] : memref<8x32xf32, #tpu.memory_space<vmem>>, vector<8x32xf32>
    %c0_1 = arith.constant 0 : index
    %c0_2 = arith.constant 0 : index
    %1 = vector.load %arg3[%c0_1, %c0_2] : memref<32x96xf32, #tpu.memory_space<vmem>>, vector<32x96xf32>
    %cst = arith.constant dense<0.000000e+00> : vector<8x96xf32>
    %2 = tpu.matmul %0, %1, %cst {dimension_numbers = #tpu.dot_dimension_numbers<[1], [0], [0], [1], [0, 0, 1, 1], [], []>} : vector<8x32xf32>, vector<32x96xf32>, vector<8x96xf32> -> vector<8x96xf32>
    %3 = vector.extract_strided_slice %2 {offsets = [0, 0], sizes = [8, 32], strides = [1, 1]} : vector<8x96xf32> to vector<8x32xf32>
    %4 = vector.extract_strided_slice %2 {offsets = [0, 32], sizes = [8, 32], strides = [1, 1]} : vector<8x96xf32> to vector<8x32xf32>
    %5 = vector.extract_strided_slice %2 {offsets = [0, 64], sizes = [8, 32], strides = [1, 1]} : vector<8x96xf32> to vector<8x32xf32>
    %6 = vector.extract_strided_slice %3 {offsets = [0, 0], sizes = [8, 8], strides = [1, 1]} : vector<8x32xf32> to vector<8x8xf32>
    %7 = vector.extract_strided_slice %3 {offsets = [0, 8], sizes = [8, 8], strides = [1, 1]} : vector<8x32xf32> to vector<8x8xf32>
    %8 = vector.extract_strided_slice %3 {offsets = [0, 16], sizes = [8, 8], strides = [1, 1]} : vector<8x32xf32> to vector<8x8xf32>
    %9 = vector.extract_strided_slice %3 {offsets = [0, 24], sizes = [8, 8], strides = [1, 1]} : vector<8x32xf32> to vector<8x8xf32>
    %10 = vector.shape_cast %6 : vector<8x8xf32> to vector<1x8x8xf32>
    %11 = vector.shape_cast %7 : vector<8x8xf32> to vector<1x8x8xf32>
    %12 = vector.shape_cast %8 : vector<8x8xf32> to vector<1x8x8xf32>
    %13 = vector.shape_cast %9 : vector<8x8xf32> to vector<1x8x8xf32>
    %14 = tpu.concatenate %10, %11, %12, %13 in 0 : vector<1x8x8xf32>, vector<1x8x8xf32>, vector<1x8x8xf32>, vector<1x8x8xf32> -> vector<4x8x8xf32>
    %15 = vector.extract_strided_slice %4 {offsets = [0, 0], sizes = [8, 8], strides = [1, 1]} : vector<8x32xf32> to vector<8x8xf32>
    %16 = vector.extract_strided_slice %4 {offsets = [0, 8], sizes = [8, 8], strides = [1, 1]} : vector<8x32xf32> to vector<8x8xf32>
    %17 = vector.extract_strided_slice %4 {offsets = [0, 16], sizes = [8, 8], strides = [1, 1]} : vector<8x32xf32> to vector<8x8xf32>
    %18 = vector.extract_strided_slice %4 {offsets = [0, 24], sizes = [8, 8], strides = [1, 1]} : vector<8x32xf32> to vector<8x8xf32>
    %19 = vector.shape_cast %15 : vector<8x8xf32> to vector<1x8x8xf32>
    %20 = vector.shape_cast %16 : vector<8x8xf32> to vector<1x8x8xf32>
    %21 = vector.shape_cast %17 : vector<8x8xf32> to vector<1x8x8xf32>
    %22 = vector.shape_cast %18 : vector<8x8xf32> to vector<1x8x8xf32>
    %23 = tpu.concatenate %19, %20, %21, %22 in 0 : vector<1x8x8xf32>, vector<1x8x8xf32>, vector<1x8x8xf32>, vector<1x8x8xf32> -> vector<4x8x8xf32>
    %24 = vector.extract_strided_slice %5 {offsets = [0, 0], sizes = [8, 8], strides = [1, 1]} : vector<8x32xf32> to vector<8x8xf32>
    %25 = vector.extract_strided_slice %5 {offsets = [0, 8], sizes = [8, 8], strides = [1, 1]} : vector<8x32xf32> to vector<8x8xf32>
    %26 = vector.extract_strided_slice %5 {offsets = [0, 16], sizes = [8, 8], strides = [1, 1]} : vector<8x32xf32> to vector<8x8xf32>
    %27 = vector.extract_strided_slice %5 {offsets = [0, 24], sizes = [8, 8], strides = [1, 1]} : vector<8x32xf32> to vector<8x8xf32>
    %28 = vector.shape_cast %24 : vector<8x8xf32> to vector<1x8x8xf32>
    %29 = vector.shape_cast %25 : vector<8x8xf32> to vector<1x8x8xf32>
    %30 = vector.shape_cast %26 : vector<8x8xf32> to vector<1x8x8xf32>
    %31 = vector.shape_cast %27 : vector<8x8xf32> to vector<1x8x8xf32>
    %32 = tpu.concatenate %28, %29, %30, %31 in 0 : vector<1x8x8xf32>, vector<1x8x8xf32>, vector<1x8x8xf32>, vector<1x8x8xf32> -> vector<4x8x8xf32>
    "tpu.trace_start"() <{level = 10 : i32, message = "gqd,gkd->gqk"}> : () -> ()
    %cst_3 = arith.constant dense<0.000000e+00> : vector<4x8x8xf32>
    %33 = tpu.matmul %14, %23, %cst_3 {dimension_numbers = #tpu.dot_dimension_numbers<[2], [2], [1], [1], [0, 0, 0, 1, 1, 1], [0], [0]>} : vector<4x8x8xf32>, vector<4x8x8xf32>, vector<4x8x8xf32> -> vector<4x8x8xf32>
    "tpu.trace_stop"() : () -> ()
    %c0_4 = arith.constant 0 : index
    %c0_5 = arith.constant 0 : index
    %c0_6 = arith.constant 0 : index
    %34 = vector.load %arg2[%c0_4, %c0_5, %c0_6] : memref<1x8x8xf32, #tpu.memory_space<vmem>>, vector<1x8x8xf32>
    %35 = vector.broadcast %34 : vector<1x8x8xf32> to vector<4x8x8xf32>
    %36 = arith.addf %33, %35 : vector<4x8x8xf32>
    %cst_7 = arith.constant dense<0xFF800000> : vector<4x8xf32>
    %37 = vector.multi_reduction <maximumf>, %36, %cst_7 [2] : vector<4x8x8xf32> to vector<4x8xf32>
    %38 = vector.shape_cast %37 : vector<4x8xf32> to vector<4x8x1xf32>
    %39 = vector.broadcast %38 : vector<4x8x1xf32> to vector<4x8x8xf32>
    %40 = arith.subf %36, %39 : vector<4x8x8xf32>
    %41 = math.exp %40 : vector<4x8x8xf32>
    %cst_8 = arith.constant dense<0.000000e+00> : vector<4x8xf32>
    %42 = vector.multi_reduction <add>, %41, %cst_8 [2] : vector<4x8x8xf32> to vector<4x8xf32>
    %43 = vector.shape_cast %42 : vector<4x8xf32> to vector<4x8x1xf32>
    "tpu.trace_start"() <{level = 10 : i32, message = "gqk,gkd->gqd"}> : () -> ()
    %cst_9 = arith.constant dense<0.000000e+00> : vector<4x8x8xf32>
    %44 = tpu.matmul %41, %32, %cst_9 {dimension_numbers = #tpu.dot_dimension_numbers<[2], [1], [1], [2], [0, 0, 0, 1, 1, 2], [0], [0]>} : vector<4x8x8xf32>, vector<4x8x8xf32>, vector<4x8x8xf32> -> vector<4x8x8xf32>
    "tpu.trace_stop"() : () -> ()
    %45 = tpu.reciprocal %43 {approx = true} : vector<4x8x1xf32> -> vector<4x8x1xf32>
    %46 = vector.broadcast %45 : vector<4x8x1xf32> to vector<4x8x8xf32>
    %47 = arith.mulf %44, %46 : vector<4x8x8xf32>
    %c0_10 = arith.constant 0 : index
    %c0_11 = arith.constant 0 : index
    %c0_12 = arith.constant 0 : index
    %48 = vector.load %arg4[%c0_10, %c0_11, %c0_12] : memref<4x8x32xf32, #tpu.memory_space<vmem>>, vector<4x8x32xf32>
    %49 = vector.extract_strided_slice %47 {offsets = [0, 0, 0], sizes = [1, 8, 8], strides = [1, 1, 1]} : vector<4x8x8xf32> to vector<1x8x8xf32>
    %50 = vector.shape_cast %49 : vector<1x8x8xf32> to vector<8x8xf32>
    %51 = vector.extract_strided_slice %48 {offsets = [0, 0, 0], sizes = [1, 8, 32], strides = [1, 1, 1]} : vector<4x8x32xf32> to vector<1x8x32xf32>
    %52 = vector.shape_cast %51 : vector<1x8x32xf32> to vector<8x32xf32>
    %cst_13 = arith.constant dense<0.000000e+00> : vector<8x32xf32>
    %53 = tpu.matmul %50, %52, %cst_13 {dimension_numbers = #tpu.dot_dimension_numbers<[1], [0], [0], [1], [0, 0, 1, 1], [], []>} : vector<8x8xf32>, vector<8x32xf32>, vector<8x32xf32> -> vector<8x32xf32>
    %54 = vector.extract_strided_slice %47 {offsets = [1, 0, 0], sizes = [1, 8, 8], strides = [1, 1, 1]} : vector<4x8x8xf32> to vector<1x8x8xf32>
    %55 = vector.shape_cast %54 : vector<1x8x8xf32> to vector<8x8xf32>
    %56 = vector.extract_strided_slice %48 {offsets = [1, 0, 0], sizes = [1, 8, 32], strides = [1, 1, 1]} : vector<4x8x32xf32> to vector<1x8x32xf32>
    %57 = vector.shape_cast %56 : vector<1x8x32xf32> to vector<8x32xf32>
    %cst_14 = arith.constant dense<0.000000e+00> : vector<8x32xf32>
    %58 = tpu.matmul %55, %57, %cst_14 {dimension_numbers = #tpu.dot_dimension_numbers<[1], [0], [0], [1], [0, 0, 1, 1], [], []>} : vector<8x8xf32>, vector<8x32xf32>, vector<8x32xf32> -> vector<8x32xf32>
    %59 = arith.addf %53, %58 : vector<8x32xf32>
    %60 = vector.extract_strided_slice %47 {offsets = [2, 0, 0], sizes = [1, 8, 8], strides = [1, 1, 1]} : vector<4x8x8xf32> to vector<1x8x8xf32>
    %61 = vector.shape_cast %60 : vector<1x8x8xf32> to vector<8x8xf32>
    %62 = vector.extract_strided_slice %48 {offsets = [2, 0, 0], sizes = [1, 8, 32], strides = [1, 1, 1]} : vector<4x8x32xf32> to vector<1x8x32xf32>
    %63 = vector.shape_cast %62 : vector<1x8x32xf32> to vector<8x32xf32>
    %cst_15 = arith.constant dense<0.000000e+00> : vector<8x32xf32>
    %64 = tpu.matmul %61, %63, %cst_15 {dimension_numbers = #tpu.dot_dimension_numbers<[1], [0], [0], [1], [0, 0, 1, 1], [], []>} : vector<8x8xf32>, vector<8x32xf32>, vector<8x32xf32> -> vector<8x32xf32>
    %65 = arith.addf %59, %64 : vector<8x32xf32>
    %66 = vector.extract_strided_slice %47 {offsets = [3, 0, 0], sizes = [1, 8, 8], strides = [1, 1, 1]} : vector<4x8x8xf32> to vector<1x8x8xf32>
    %67 = vector.shape_cast %66 : vector<1x8x8xf32> to vector<8x8xf32>
    %68 = vector.extract_strided_slice %48 {offsets = [3, 0, 0], sizes = [1, 8, 32], strides = [1, 1, 1]} : vector<4x8x32xf32> to vector<1x8x32xf32>
    %69 = vector.shape_cast %68 : vector<1x8x32xf32> to vector<8x32xf32>
    %cst_16 = arith.constant dense<0.000000e+00> : vector<8x32xf32>
    %70 = tpu.matmul %67, %69, %cst_16 {dimension_numbers = #tpu.dot_dimension_numbers<[1], [0], [0], [1], [0, 0, 1, 1], [], []>} : vector<8x8xf32>, vector<8x32xf32>, vector<8x32xf32> -> vector<8x32xf32>
    %71 = arith.addf %65, %70 : vector<8x32xf32>
    %72 = arith.addf %0, %71 : vector<8x32xf32>
    %c0_17 = arith.constant 0 : index
    %c0_18 = arith.constant 0 : index
    %73 = vector.load %arg9[%c0_17, %c0_18] : memref<1x32xf32, #tpu.memory_space<vmem>>, vector<1x32xf32>
    %c0_19 = arith.constant 0 : index
    %c0_20 = arith.constant 0 : index
    %74 = vector.load %arg10[%c0_19, %c0_20] : memref<1x32xf32, #tpu.memory_space<vmem>>, vector<1x32xf32>
    %cst_21 = arith.constant dense<0.000000e+00> : vector<8xf32>
    %75 = vector.multi_reduction <add>, %72, %cst_21 [1] : vector<8x32xf32> to vector<8xf32>
    %76 = vector.shape_cast %75 : vector<8xf32> to vector<8x1xf32>
    %cst_22 = arith.constant 3.200000e+01 : f32
    %77 = vector.broadcast %cst_22 : f32 to vector<8x1xf32>
    %78 = arith.divf %76, %77 : vector<8x1xf32>
    %79 = vector.broadcast %78 : vector<8x1xf32> to vector<8x32xf32>
    %80 = arith.subf %72, %79 : vector<8x32xf32>
    %81 = arith.mulf %80, %80 : vector<8x32xf32>
    %cst_23 = arith.constant dense<0.000000e+00> : vector<8xf32>
    %82 = vector.multi_reduction <add>, %81, %cst_23 [1] : vector<8x32xf32> to vector<8xf32>
    %83 = vector.shape_cast %82 : vector<8xf32> to vector<8x1xf32>
    %cst_24 = arith.constant 3.200000e+01 : f32
    %84 = vector.broadcast %cst_24 : f32 to vector<8x1xf32>
    %85 = arith.divf %83, %84 : vector<8x1xf32>
    %86 = vector.broadcast %78 : vector<8x1xf32> to vector<8x32xf32>
    %87 = arith.subf %72, %86 : vector<8x32xf32>
    %cst_25 = arith.constant 9.99999997E-7 : f32
    %88 = vector.broadcast %cst_25 : f32 to vector<8x1xf32>
    %89 = arith.addf %85, %88 : vector<8x1xf32>
    %90 = math.rsqrt %89 : vector<8x1xf32>
    %91 = vector.broadcast %90 : vector<8x1xf32> to vector<8x32xf32>
    %92 = arith.mulf %87, %91 : vector<8x32xf32>
    %93 = vector.broadcast %73 : vector<1x32xf32> to vector<8x32xf32>
    %94 = arith.mulf %92, %93 : vector<8x32xf32>
    %95 = vector.broadcast %74 : vector<1x32xf32> to vector<8x32xf32>
    %96 = arith.addf %94, %95 : vector<8x32xf32>
    %c0_26 = arith.constant 0 : index
    %c0_27 = arith.constant 0 : index
    %97 = vector.load %arg5[%c0_26, %c0_27] : memref<32x64xf32, #tpu.memory_space<vmem>>, vector<32x64xf32>
    %cst_28 = arith.constant dense<0.000000e+00> : vector<8x64xf32>
    %98 = tpu.matmul %96, %97, %cst_28 {dimension_numbers = #tpu.dot_dimension_numbers<[1], [0], [0], [1], [0, 0, 1, 1], [], []>} : vector<8x32xf32>, vector<32x64xf32>, vector<8x64xf32> -> vector<8x64xf32>
    %c0_29 = arith.constant 0 : index
    %c0_30 = arith.constant 0 : index
    %99 = vector.load %arg6[%c0_29, %c0_30] : memref<1x64xf32, #tpu.memory_space<vmem>>, vector<1x64xf32>
    %100 = vector.broadcast %99 : vector<1x64xf32> to vector<8x64xf32>
    %101 = arith.addf %98, %100 : vector<8x64xf32>
    %cst_31 = arith.constant 0.000000e+00 : f32
    %102 = vector.broadcast %cst_31 : f32 to vector<8x64xf32>
    %103 = arith.maximumf %101, %102 : vector<8x64xf32>
    %c0_32 = arith.constant 0 : index
    %c0_33 = arith.constant 0 : index
    %104 = vector.load %arg7[%c0_32, %c0_33] : memref<64x32xf32, #tpu.memory_space<vmem>>, vector<64x32xf32>
    %cst_34 = arith.constant dense<0.000000e+00> : vector<8x32xf32>
    %105 = tpu.matmul %103, %104, %cst_34 {dimension_numbers = #tpu.dot_dimension_numbers<[1], [0], [0], [1], [0, 0, 1, 1], [], []>} : vector<8x64xf32>, vector<64x32xf32>, vector<8x32xf32> -> vector<8x32xf32>
    %c0_35 = arith.constant 0 : index
    %c0_36 = arith.constant 0 : index
    %106 = vector.load %arg8[%c0_35, %c0_36] : memref<1x32xf32, #tpu.memory_space<vmem>>, vector<1x32xf32>
    %107 = vector.broadcast %106 : vector<1x32xf32> to vector<8x32xf32>
    %108 = arith.addf %105, %107 : vector<8x32xf32>
    %109 = arith.addf %96, %108 : vector<8x32xf32>
    %c0_37 = arith.constant 0 : index
    %c0_38 = arith.constant 0 : index
    %110 = vector.load %arg11[%c0_37, %c0_38] : memref<1x32xf32, #tpu.memory_space<vmem>>, vector<1x32xf32>
    %c0_39 = arith.constant 0 : index
    %c0_40 = arith.constant 0 : index
    %111 = vector.load %arg12[%c0_39, %c0_40] : memref<1x32xf32, #tpu.memory_space<vmem>>, vector<1x32xf32>
    %cst_41 = arith.constant dense<0.000000e+00> : vector<8xf32>
    %112 = vector.multi_reduction <add>, %109, %cst_41 [1] : vector<8x32xf32> to vector<8xf32>
    %113 = vector.shape_cast %112 : vector<8xf32> to vector<8x1xf32>
    %cst_42 = arith.constant 3.200000e+01 : f32
    %114 = vector.broadcast %cst_42 : f32 to vector<8x1xf32>
    %115 = arith.divf %113, %114 : vector<8x1xf32>
    %116 = vector.broadcast %115 : vector<8x1xf32> to vector<8x32xf32>
    %117 = arith.subf %109, %116 : vector<8x32xf32>
    %118 = arith.mulf %117, %117 : vector<8x32xf32>
    %cst_43 = arith.constant dense<0.000000e+00> : vector<8xf32>
    %119 = vector.multi_reduction <add>, %118, %cst_43 [1] : vector<8x32xf32> to vector<8xf32>
    %120 = vector.shape_cast %119 : vector<8xf32> to vector<8x1xf32>
    %cst_44 = arith.constant 3.200000e+01 : f32
    %121 = vector.broadcast %cst_44 : f32 to vector<8x1xf32>
    %122 = arith.divf %120, %121 : vector<8x1xf32>
    %123 = vector.broadcast %115 : vector<8x1xf32> to vector<8x32xf32>
    %124 = arith.subf %109, %123 : vector<8x32xf32>
    %cst_45 = arith.constant 9.99999997E-7 : f32
    %125 = vector.broadcast %cst_45 : f32 to vector<8x1xf32>
    %126 = arith.addf %122, %125 : vector<8x1xf32>
    %127 = math.rsqrt %126 : vector<8x1xf32>
    %128 = vector.broadcast %127 : vector<8x1xf32> to vector<8x32xf32>
    %129 = arith.mulf %124, %128 : vector<8x32xf32>
    %130 = vector.broadcast %110 : vector<1x32xf32> to vector<8x32xf32>
    %131 = arith.mulf %129, %130 : vector<8x32xf32>
    %132 = vector.broadcast %111 : vector<1x32xf32> to vector<8x32xf32>
    %133 = arith.addf %131, %132 : vector<8x32xf32>
    %c0_46 = arith.constant 0 : index
    %c0_47 = arith.constant 0 : index
    %134 = vector.load %arg13[%c0_46, %c0_47] : memref<8x32xf32, #tpu.memory_space<vmem>>, vector<8x32xf32>
    tpu.vector_store %arg13[%c0_46, %c0_47], %133 {strides = array<i32>} : memref<8x32xf32, #tpu.memory_space<vmem>>, vector<8x32xf32>,
    return
  }
  func.func @transform_0(%arg0: i32) -> (i32, i32) {
    %c0_i32 = arith.constant 0 : i32
    %c0_i32_0 = arith.constant 0 : i32
    return %arg0, %c0_i32 : i32, i32
  }
  func.func @transform_1(%arg0: i32) -> (i32, i32, i32) {
    %c0_i32 = arith.constant 0 : i32
    %c0_i32_0 = arith.constant 0 : i32
    %c0_i32_1 = arith.constant 0 : i32
    return %arg0, %c0_i32, %c0_i32_0 : i32, i32, i32
  }
  func.func @transform_2(%arg0: i32) -> (i32, i32) {
    %c0_i32 = arith.constant 0 : i32
    %c0_i32_0 = arith.constant 0 : i32
    %c0_i32_1 = arith.constant 0 : i32
    return %c0_i32, %c0_i32_0 : i32, i32
  }
  func.func @transform_3(%arg0: i32) -> (i32, i32, i32) {
    %c0_i32 = arith.constant 0 : i32
    %c0_i32_0 = arith.constant 0 : i32
    %c0_i32_1 = arith.constant 0 : i32
    %c0_i32_2 = arith.constant 0 : i32
    return %c0_i32, %c0_i32_0, %c0_i32_1 : i32, i32, i32
  }
  func.func @transform_4(%arg0: i32) -> (i32, i32) {
    %c0_i32 = arith.constant 0 : i32
    %c0_i32_0 = arith.constant 0 : i32
    %c0_i32_1 = arith.constant 0 : i32
    return %c0_i32, %c0_i32_0 : i32, i32
  }
  func.func @transform_5(%arg0: i32) -> (i32, i32) {
    %c0_i32 = arith.constant 0 : i32
    %c0_i32_0 = arith.constant 0 : i32
    %c0_i32_1 = arith.constant 0 : i32
    return %c0_i32, %c0_i32_0 : i32, i32
  }
  func.func @transform_6(%arg0: i32) -> (i32, i32) {
    %c0_i32 = arith.constant 0 : i32
    %c0_i32_0 = arith.constant 0 : i32
    %c0_i32_1 = arith.constant 0 : i32
    return %c0_i32, %c0_i32_0 : i32, i32
  }
  func.func @transform_7(%arg0: i32) -> (i32, i32) {
    %c0_i32 = arith.constant 0 : i32
    %c0_i32_0 = arith.constant 0 : i32
    %c0_i32_1 = arith.constant 0 : i32
    return %c0_i32, %c0_i32_0 : i32, i32
  }
  func.func @transform_8(%arg0: i32) -> (i32, i32) {
    %c0_i32 = arith.constant 0 : i32
    %c0_i32_0 = arith.constant 0 : i32
    %c0_i32_1 = arith.constant 0 : i32
    return %c0_i32, %c0_i32_0 : i32, i32
  }
  func.func @transform_9(%arg0: i32) -> (i32, i32) {
    %c0_i32 = arith.constant 0 : i32
    %c0_i32_0 = arith.constant 0 : i32
    %c0_i32_1 = arith.constant 0 : i32
    return %c0_i32, %c0_i32_0 : i32, i32
  }
  func.func @transform_10(%arg0: i32) -> (i32, i32) {
    %c0_i32 = arith.constant 0 : i32
    %c0_i32_0 = arith.constant 0 : i32
    %c0_i32_1 = arith.constant 0 : i32
    return %c0_i32, %c0_i32_0 : i32, i32
  }
  func.func @transform_11(%arg0: i32) -> (i32, i32) {
    %c0_i32 = arith.constant 0 : i32
    %c0_i32_0 = arith.constant 0 : i32
    %c0_i32_1 = arith.constant 0 : i32
    return %c0_i32, %c0_i32_0 : i32, i32
  }
  func.func @transform_12(%arg0: i32) -> (i32, i32) {
    %c0_i32 = arith.constant 0 : i32
    %c0_i32_0 = arith.constant 0 : i32
    return %arg0, %c0_i32 : i32, i32
  }
}

module attributes {stable_mosaic.version = 11 : i64} {
  func.func @_transformer_block_kernel(%arg0: i32, %arg1: memref<8x32xf32, #tpu.memory_space<vmem>>, %arg2: memref<1x8x8xf32, #tpu.memory_space<vmem>>, %arg3: memref<32x96xf32, #tpu.memory_space<vmem>>, %arg4: memref<4x8x32xf32, #tpu.memory_space<vmem>>, %arg5: memref<32x64xf32, #tpu.memory_space<vmem>>, %arg6: memref<1x64xf32, #tpu.memory_space<vmem>>, %arg7: memref<64x32xf32, #tpu.memory_space<vmem>>, %arg8: memref<1x32xf32, #tpu.memory_space<vmem>>, %arg9: memref<1x32xf32, #tpu.memory_space<vmem>>, %arg10: memref<1x32xf32, #tpu.memory_space<vmem>>, %arg11: memref<1x32xf32, #tpu.memory_space<vmem>>, %arg12: memref<1x32xf32, #tpu.memory_space<vmem>>, %arg13: memref<8x32xf32, #tpu.memory_space<vmem>>) attributes {dimension_semantics = [#tpu.dimension_semantics<parallel>], iteration_bounds = array<i64: 2>, scalar_prefetch = 0 : i64, scratch_operands = 0 : i64, tpu.core_type = #tpu.core_type<tc>, window_params = [{transform_indices = @transform_0, window_bounds = array<i64: 8, 32>}, {transform_indices = @transform_1, window_bounds = array<i64: 1, 8, 8>}, {pipeline_mode = #tpu.pipeline_mode<synchronous>, transform_indices = @transform_2, window_bounds = array<i64: 32, 96>}, {pipeline_mode = #tpu.pipeline_mode<synchronous>, transform_indices = @transform_3, window_bounds = array<i64: 4, 8, 32>}, {pipeline_mode = #tpu.pipeline_mode<synchronous>, transform_indices = @transform_4, window_bounds = array<i64: 32, 64>}, {pipeline_mode = #tpu.pipeline_mode<synchronous>, transform_indices = @transform_5, window_bounds = array<i64: 1, 64>}, {pipeline_mode = #tpu.pipeline_mode<synchronous>, transform_indices = @transform_6, window_bounds = array<i64: 64, 32>}, {pipeline_mode = #tpu.pipeline_mode<synchronous>, transform_indices = @transform_7, window_bounds = array<i64: 1, 32>}, {pipeline_mode = #tpu.pipeline_mode<synchronous>, transform_indices = @transform_8, window_bounds = array<i64: 1, 32>}, {pipeline_mode = #tpu.pipeline_mode<synchronous>, transform_indices = @transform_9, window_bounds = array<i64: 1, 32>}, {pipeline_mode = #tpu.pipeline_mode<synchronous>, transform_indices = @transform_10, window_bounds = array<i64: 1, 32>}, {pipeline_mode = #tpu.pipeline_mode<synchronous>, transform_indices = @transform_11, window_bounds = array<i64: 1, 32>}, {transform_indices = @transform_12, window_bounds = array<i64: 8, 32>}]} {
    %c0 = arith.constant 0 : index
    %c0_0 = arith.constant 0 : index
    %0 = vector.load %arg1[%c0, %c0_0] : memref<8x32xf32, #tpu.memory_space<vmem>>, vector<8x32xf32>
    %c0_1 = arith.constant 0 : index
    %c0_2 = arith.constant 0 : index
    %1 = vector.load %arg3[%c0_1, %c0_2] : memref<32x96xf32, #tpu.memory_space<vmem>>, vector<32x96xf32>
    %cst = arith.constant dense<0.000000e+00> : vector<8x96xf32>
    %2 = tpu.matmul %0, %1, %cst {dimension_numbers = #tpu.dot_dimension_numbers<[1], [0], [0], [1], [0, 0, 1, 1], [], []>} : vector<8x32xf32>, vector<32x96xf32>, vector<8x96xf32> -> vector<8x96xf32>
    %3 = vector.extract_strided_slice %2 {offsets = [0, 0], sizes = [8, 32], strides = [1, 1]} : vector<8x96xf32> to vector<8x32xf32>
    %4 = vector.extract_strided_slice %2 {offsets = [0, 32], sizes = [8, 32], strides = [1, 1]} : vector<8x96xf32> to vector<8x32xf32>
    %5 = vector.extract_strided_slice %2 {offsets = [0, 64], sizes = [8, 32], strides = [1, 1]} : vector<8x96xf32> to vector<8x32xf32>
    %6 = vector.extract_strided_slice %3 {offsets = [0, 0], sizes = [8, 8], strides = [1, 1]} : vector<8x32xf32> to vector<8x8xf32>
    %7 = vector.extract_strided_slice %3 {offsets = [0, 8], sizes = [8, 8], strides = [1, 1]} : vector<8x32xf32> to vector<8x8xf32>
    %8 = vector.extract_strided_slice %3 {offsets = [0, 16], sizes = [8, 8], strides = [1, 1]} : vector<8x32xf32> to vector<8x8xf32>
    %9 = vector.extract_strided_slice %3 {offsets = [0, 24], sizes = [8, 8], strides = [1, 1]} : vector<8x32xf32> to vector<8x8xf32>
    %10 = vector.shape_cast %6 : vector<8x8xf32> to vector<1x8x8xf32>
    %11 = vector.shape_cast %7 : vector<8x8xf32> to vector<1x8x8xf32>
    %12 = vector.shape_cast %8 : vector<8x8xf32> to vector<1x8x8xf32>
    %13 = vector.shape_cast %9 : vector<8x8xf32> to vector<1x8x8xf32>
    %14 = tpu.concatenate %10, %11, %12, %13 in 0 : vector<1x8x8xf32>, vector<1x8x8xf32>, vector<1x8x8xf32>, vector<1x8x8xf32> -> vector<4x8x8xf32>
    %15 = vector.extract_strided_slice %4 {offsets = [0, 0], sizes = [8, 8], strides = [1, 1]} : vector<8x32xf32> to vector<8x8xf32>
    %16 = vector.extract_strided_slice %4 {offsets = [0, 8], sizes = [8, 8], strides = [1, 1]} : vector<8x32xf32> to vector<8x8xf32>
    %17 = vector.extract_strided_slice %4 {offsets = [0, 16], sizes = [8, 8], strides = [1, 1]} : vector<8x32xf32> to vector<8x8xf32>
    %18 = vector.extract_strided_slice %4 {offsets = [0, 24], sizes = [8, 8], strides = [1, 1]} : vector<8x32xf32> to vector<8x8xf32>
    %19 = vector.shape_cast %15 : vector<8x8xf32> to vector<1x8x8xf32>
    %20 = vector.shape_cast %16 : vector<8x8xf32> to vector<1x8x8xf32>
    %21 = vector.shape_cast %17 : vector<8x8xf32> to vector<1x8x8xf32>
    %22 = vector.shape_cast %18 : vector<8x8xf32> to vector<1x8x8xf32>
    %23 = tpu.concatenate %19, %20, %21, %22 in 0 : vector<1x8x8xf32>, vector<1x8x8xf32>, vector<1x8x8xf32>, vector<1x8x8xf32> -> vector<4x8x8xf32>
    %24 = vector.extract_strided_slice %5 {offsets = [0, 0], sizes = [8, 8], strides = [1, 1]} : vector<8x32xf32> to vector<8x8xf32>
    %25 = vector.extract_strided_slice %5 {offsets = [0, 8], sizes = [8, 8], strides = [1, 1]} : vector<8x32xf32> to vector<8x8xf32>
    %26 = vector.extract_strided_slice %5 {offsets = [0, 16], sizes = [8, 8], strides = [1, 1]} : vector<8x32xf32> to vector<8x8xf32>
    %27 = vector.extract_strided_slice %5 {offsets = [0, 24], sizes = [8, 8], strides = [1, 1]} : vector<8x32xf32> to vector<8x8xf32>
    %28 = vector.shape_cast %24 : vector<8x8xf32> to vector<1x8x8xf32>
    %29 = vector.shape_cast %25 : vector<8x8xf32> to vector<1x8x8xf32>
    %30 = vector.shape_cast %26 : vector<8x8xf32> to vector<1x8x8xf32>
    %31 = vector.shape_cast %27 : vector<8x8xf32> to vector<1x8x8xf32>
    %32 = tpu.concatenate %28, %29, %30, %31 in 0 : vector<1x8x8xf32>, vector<1x8x8xf32>, vector<1x8x8xf32>, vector<1x8x8xf32> -> vector<4x8x8xf32>
    "tpu.trace_start"() <{level = 10 : i32, message = "gqd,gkd->gqk"}> : () -> ()
    %cst_3 = arith.constant dense<0.000000e+00> : vector<4x8x8xf32>
    %33 = tpu.matmul %14, %23, %cst_3 {dimension_numbers = #tpu.dot_dimension_numbers<[2], [2], [1], [1], [0, 0, 0, 1, 1, 1], [0], [0]>} : vector<4x8x8xf32>, vector<4x8x8xf32>, vector<4x8x8xf32> -> vector<4x8x8xf32>
    "tpu.trace_stop"() : () -> ()
    %c0_4 = arith.constant 0 : index
    %c0_5 = arith.constant 0 : index
    %c0_6 = arith.constant 0 : index
    %34 = vector.load %arg2[%c0_4, %c0_5, %c0_6] : memref<1x8x8xf32, #tpu.memory_space<vmem>>, vector<1x8x8xf32>
    %35 = vector.broadcast %34 : vector<1x8x8xf32> to vector<4x8x8xf32>
    %36 = arith.addf %33, %35 : vector<4x8x8xf32>
    %cst_7 = arith.constant dense<0xFF800000> : vector<4x8xf32>
    %37 = vector.multi_reduction <maximumf>, %36, %cst_7 [2] : vector<4x8x8xf32> to vector<4x8xf32>
    %38 = vector.shape_cast %37 : vector<4x8xf32> to vector<4x8x1xf32>
    %39 = vector.broadcast %38 : vector<4x8x1xf32> to vector<4x8x8xf32>
    %40 = arith.subf %36, %39 : vector<4x8x8xf32>
    %41 = math.exp %40 : vector<4x8x8xf32>
    %cst_8 = arith.constant dense<0.000000e+00> : vector<4x8xf32>
    %42 = vector.multi_reduction <add>, %41, %cst_8 [2] : vector<4x8x8xf32> to vector<4x8xf32>
    %43 = vector.shape_cast %42 : vector<4x8xf32> to vector<4x8x1xf32>
    "tpu.trace_start"() <{level = 10 : i32, message = "gqk,gkd->gqd"}> : () -> ()
    %cst_9 = arith.constant dense<0.000000e+00> : vector<4x8x8xf32>
    %44 = tpu.matmul %41, %32, %cst_9 {dimension_numbers = #tpu.dot_dimension_numbers<[2], [1], [1], [2], [0, 0, 0, 1, 1, 2], [0], [0]>} : vector<4x8x8xf32>, vector<4x8x8xf32>, vector<4x8x8xf32> -> vector<4x8x8xf32>
    "tpu.trace_stop"() : () -> ()
    %45 = tpu.reciprocal %43 {approx = true} : vector<4x8x1xf32> -> vector<4x8x1xf32>
    %46 = vector.broadcast %45 : vector<4x8x1xf32> to vector<4x8x8xf32>
    %47 = arith.mulf %44, %46 : vector<4x8x8xf32>
    %c0_10 = arith.constant 0 : index
    %c0_11 = arith.constant 0 : index
    %c0_12 = arith.constant 0 : index
    %48 = vector.load %arg4[%c0_10, %c0_11, %c0_12] : memref<4x8x32xf32, #tpu.memory_space<vmem>>, vector<4x8x32xf32>
    %49 = vector.extract_strided_slice %47 {offsets = [0, 0, 0], sizes = [1, 8, 8], strides = [1, 1, 1]} : vector<4x8x8xf32> to vector<1x8x8xf32>
    %50 = vector.shape_cast %49 : vector<1x8x8xf32> to vector<8x8xf32>
    %51 = vector.extract_strided_slice %48 {offsets = [0, 0, 0], sizes = [1, 8, 32], strides = [1, 1, 1]} : vector<4x8x32xf32> to vector<1x8x32xf32>
    %52 = vector.shape_cast %51 : vector<1x8x32xf32> to vector<8x32xf32>
    %cst_13 = arith.constant dense<0.000000e+00> : vector<8x32xf32>
    %53 = tpu.matmul %50, %52, %cst_13 {dimension_numbers = #tpu.dot_dimension_numbers<[1], [0], [0], [1], [0, 0, 1, 1], [], []>} : vector<8x8xf32>, vector<8x32xf32>, vector<8x32xf32> -> vector<8x32xf32>
    %54 = vector.extract_strided_slice %47 {offsets = [1, 0, 0], sizes = [1, 8, 8], strides = [1, 1, 1]} : vector<4x8x8xf32> to vector<1x8x8xf32>
    %55 = vector.shape_cast %54 : vector<1x8x8xf32> to vector<8x8xf32>
    %56 = vector.extract_strided_slice %48 {offsets = [1, 0, 0], sizes = [1, 8, 32], strides = [1, 1, 1]} : vector<4x8x32xf32> to vector<1x8x32xf32>
    %57 = vector.shape_cast %56 : vector<1x8x32xf32> to vector<8x32xf32>
    %cst_14 = arith.constant dense<0.000000e+00> : vector<8x32xf32>
    %58 = tpu.matmul %55, %57, %cst_14 {dimension_numbers = #tpu.dot_dimension_numbers<[1], [0], [0], [1], [0, 0, 1, 1], [], []>} : vector<8x8xf32>, vector<8x32xf32>, vector<8x32xf32> -> vector<8x32xf32>
    %59 = arith.addf %53, %58 : vector<8x32xf32>
    %60 = vector.extract_strided_slice %47 {offsets = [2, 0, 0], sizes = [1, 8, 8], strides = [1, 1, 1]} : vector<4x8x8xf32> to vector<1x8x8xf32>
    %61 = vector.shape_cast %60 : vector<1x8x8xf32> to vector<8x8xf32>
    %62 = vector.extract_strided_slice %48 {offsets = [2, 0, 0], sizes = [1, 8, 32], strides = [1, 1, 1]} : vector<4x8x32xf32> to vector<1x8x32xf32>
    %63 = vector.shape_cast %62 : vector<1x8x32xf32> to vector<8x32xf32>
    %cst_15 = arith.constant dense<0.000000e+00> : vector<8x32xf32>
    %64 = tpu.matmul %61, %63, %cst_15 {dimension_numbers = #tpu.dot_dimension_numbers<[1], [0], [0], [1], [0, 0, 1, 1], [], []>} : vector<8x8xf32>, vector<8x32xf32>, vector<8x32xf32> -> vector<8x32xf32>
    %65 = arith.addf %59, %64 : vector<8x32xf32>
    %66 = vector.extract_strided_slice %47 {offsets = [3, 0, 0], sizes = [1, 8, 8], strides = [1, 1, 1]} : vector<4x8x8xf32> to vector<1x8x8xf32>
    %67 = vector.shape_cast %66 : vector<1x8x8xf32> to vector<8x8xf32>
    %68 = vector.extract_strided_slice %48 {offsets = [3, 0, 0], sizes = [1, 8, 32], strides = [1, 1, 1]} : vector<4x8x32xf32> to vector<1x8x32xf32>
    %69 = vector.shape_cast %68 : vector<1x8x32xf32> to vector<8x32xf32>
    %cst_16 = arith.constant dense<0.000000e+00> : vector<8x32xf32>
    %70 = tpu.matmul %67, %69, %cst_16 {dimension_numbers = #tpu.dot_dimension_numbers<[1], [0], [0], [1], [0, 0, 1, 1], [], []>} : vector<8x8xf32>, vector<8x32xf32>, vector<8x32xf32> -> vector<8x32xf32>
    %71 = arith.addf %65, %70 : vector<8x32xf32>
    %72 = arith.addf %0, %71 : vector<8x32xf32>
    %c0_17 = arith.constant 0 : index
    %c0_18 = arith.constant 0 : index
    %73 = vector.load %arg9[%c0_17, %c0_18] : memref<1x32xf32, #tpu.memory_space<vmem>>, vector<1x32xf32>
    %c0_19 = arith.constant 0 : index
    %c0_20 = arith.constant 0 : index
    %74 = vector.load %arg10[%c0_19, %c0_20] : memref<1x32xf32, #tpu.memory_space<vmem>>, vector<1x32xf32>
    %cst_21 = arith.constant dense<0.000000e+00> : vector<8xf32>
    %75 = vector.multi_reduction <add>, %72, %cst_21 [1] : vector<8x32xf32> to vector<8xf32>
    %76 = vector.shape_cast %75 : vector<8xf32> to vector<8x1xf32>
    %cst_22 = arith.constant 3.200000e+01 : f32
    %77 = vector.broadcast %cst_22 : f32 to vector<8x1xf32>
    %78 = arith.divf %76, %77 : vector<8x1xf32>
    %79 = vector.broadcast %78 : vector<8x1xf32> to vector<8x32xf32>
    %80 = arith.subf %72, %79 : vector<8x32xf32>
    %81 = arith.mulf %80, %80 : vector<8x32xf32>
    %cst_23 = arith.constant dense<0.000000e+00> : vector<8xf32>
    %82 = vector.multi_reduction <add>, %81, %cst_23 [1] : vector<8x32xf32> to vector<8xf32>
    %83 = vector.shape_cast %82 : vector<8xf32> to vector<8x1xf32>
    %cst_24 = arith.constant 3.200000e+01 : f32
    %84 = vector.broadcast %cst_24 : f32 to vector<8x1xf32>
    %85 = arith.divf %83, %84 : vector<8x1xf32>
    %86 = vector.broadcast %78 : vector<8x1xf32> to vector<8x32xf32>
    %87 = arith.subf %72, %86 : vector<8x32xf32>
    %cst_25 = arith.constant 9.99999997E-7 : f32
    %88 = vector.broadcast %cst_25 : f32 to vector<8x1xf32>
    %89 = arith.addf %85, %88 : vector<8x1xf32>
    %90 = math.rsqrt %89 : vector<8x1xf32>
    %91 = vector.broadcast %90 : vector<8x1xf32> to vector<8x32xf32>
    %92 = arith.mulf %87, %91 : vector<8x32xf32>
    %93 = vector.broadcast %73 : vector<1x32xf32> to vector<8x32xf32>
    %94 = arith.mulf %92, %93 : vector<8x32xf32>
    %95 = vector.broadcast %74 : vector<1x32xf32> to vector<8x32xf32>
    %96 = arith.addf %94, %95 : vector<8x32xf32>
    %c0_26 = arith.constant 0 : index
    %c0_27 = arith.constant 0 : index
    %97 = vector.load %arg5[%c0_26, %c0_27] : memref<32x64xf32, #tpu.memory_space<vmem>>, vector<32x64xf32>
    %cst_28 = arith.constant dense<0.000000e+00> : vector<8x64xf32>
    %98 = tpu.matmul %96, %97, %cst_28 {dimension_numbers = #tpu.dot_dimension_numbers<[1], [0], [0], [1], [0, 0, 1, 1], [], []>} : vector<8x32xf32>, vector<32x64xf32>, vector<8x64xf32> -> vector<8x64xf32>
    %c0_29 = arith.constant 0 : index
    %c0_30 = arith.constant 0 : index
    %99 = vector.load %arg6[%c0_29, %c0_30] : memref<1x64xf32, #tpu.memory_space<vmem>>, vector<1x64xf32>
    %100 = vector.broadcast %99 : vector<1x64xf32> to vector<8x64xf32>
    %101 = arith.addf %98, %100 : vector<8x64xf32>
    %cst_31 = arith.constant 0.000000e+00 : f32
    %102 = vector.broadcast %cst_31 : f32 to vector<8x64xf32>
    %103 = arith.maximumf %101, %102 : vector<8x64xf32>
    %c0_32 = arith.constant 0 : index
    %c0_33 = arith.constant 0 : index
    %104 = vector.load %arg7[%c0_32, %c0_33] : memref<64x32xf32, #tpu.memory_space<vmem>>, vector<64x32xf32>
    %cst_34 = arith.constant dense<0.000000e+00> : vector<8x32xf32>
    %105 = tpu.matmul %103, %104, %cst_34 {dimension_numbers = #tpu.dot_dimension_numbers<[1], [0], [0], [1], [0, 0, 1, 1], [], []>} : vector<8x64xf32>, vector<64x32xf32>, vector<8x32xf32> -> vector<8x32xf32>
    %c0_35 = arith.constant 0 : index
    %c0_36 = arith.constant 0 : index
    %106 = vector.load %arg8[%c0_35, %c0_36] : memref<1x32xf32, #tpu.memory_space<vmem>>, vector<1x32xf32>
    %107 = vector.broadcast %106 : vector<1x32xf32> to vector<8x32xf32>
    %108 = arith.addf %105, %107 : vector<8x32xf32>
    %109 = arith.addf %96, %108 : vector<8x32xf32>
    %c0_37 = arith.constant 0 : index
    %c0_38 = arith.constant 0 : index
    %110 = vector.load %arg11[%c0_37, %c0_38] : memref<1x32xf32, #tpu.memory_space<vmem>>, vector<1x32xf32>
    %c0_39 = arith.constant 0 : index
    %c0_40 = arith.constant 0 : index
    %111 = vector.load %arg12[%c0_39, %c0_40] : memref<1x32xf32, #tpu.memory_space<vmem>>, vector<1x32xf32>
    %cst_41 = arith.constant dense<0.000000e+00> : vector<8xf32>
    %112 = vector.multi_reduction <add>, %109, %cst_41 [1] : vector<8x32xf32> to vector<8xf32>
    %113 = vector.shape_cast %112 : vector<8xf32> to vector<8x1xf32>
    %cst_42 = arith.constant 3.200000e+01 : f32
    %114 = vector.broadcast %cst_42 : f32 to vector<8x1xf32>
    %115 = arith.divf %113, %114 : vector<8x1xf32>
    %116 = vector.broadcast %115 : vector<8x1xf32> to vector<8x32xf32>
    %117 = arith.subf %109, %116 : vector<8x32xf32>
    %118 = arith.mulf %117, %117 : vector<8x32xf32>
    %cst_43 = arith.constant dense<0.000000e+00> : vector<8xf32>
    %119 = vector.multi_reduction <add>, %118, %cst_43 [1] : vector<8x32xf32> to vector<8xf32>
    %120 = vector.shape_cast %119 : vector<8xf32> to vector<8x1xf32>
    %cst_44 = arith.constant 3.200000e+01 : f32
    %121 = vector.broadcast %cst_44 : f32 to vector<8x1xf32>
    %122 = arith.divf %120, %121 : vector<8x1xf32>
    %123 = vector.broadcast %115 : vector<8x1xf32> to vector<8x32xf32>
    %124 = arith.subf %109, %123 : vector<8x32xf32>
    %cst_45 = arith.constant 9.99999997E-7 : f32
    %125 = vector.broadcast %cst_45 : f32 to vector<8x1xf32>
    %126 = arith.addf %122, %125 : vector<8x1xf32>
    %127 = math.rsqrt %126 : vector<8x1xf32>
    %128 = vector.broadcast %127 : vector<8x1xf32> to vector<8x32xf32>
    %129 = arith.mulf %124, %128 : vector<8x32xf32>
    %130 = vector.broadcast %110 : vector<1x32xf32> to vector<8x32xf32>
    %131 = arith.mulf %129, %130 : vector<8x32xf32>
    %132 = vector.broadcast %111 : vector<1x32xf32> to vector<8x32xf32>
    %133 = arith.addf %131, %132 : vector<8x32xf32>
    %c0_46 = arith.constant 0 : index
    %c0_47 = arith.constant 0 : index
    %134 = vector.load %arg13[%c0_46, %c0_47] : memref<8x32xf32, #tpu.memory_space<vmem>>, vector<8x32xf32>
    tpu.vector_store %arg13[%c0_46, %c0_47], %133 {strides = array<i32>} : memref<8x32xf32, #tpu.memory_space<vmem>>, vector<8x32xf32>,
    return
  }
  func.func @transform_0(%arg0: i32) -> (i32, i32) {
    %c0_i32 = arith.constant 0 : i32
    %c0_i32_0 = arith.constant 0 : i32
    return %arg0, %c0_i32 : i32, i32
  }
  func.func @transform_1(%arg0: i32) -> (i32, i32, i32) {
    %c0_i32 = arith.constant 0 : i32
    %c0_i32_0 = arith.constant 0 : i32
    %c0_i32_1 = arith.constant 0 : i32
    return %arg0, %c0_i32, %c0_i32_0 : i32, i32, i32
  }
  func.func @transform_2(%arg0: i32) -> (i32, i32) {
    %c0_i32 = arith.constant 0 : i32
    %c0_i32_0 = arith.constant 0 : i32
    %c0_i32_1 = arith.constant 0 : i32
    return %c0_i32, %c0_i32_0 : i32, i32
  }
  func.func @transform_3(%arg0: i32) -> (i32, i32, i32) {
    %c0_i32 = arith.constant 0 : i32
    %c0_i32_0 = arith.constant 0 : i32
    %c0_i32_1 = arith.constant 0 : i32
    %c0_i32_2 = arith.constant 0 : i32
    return %c0_i32, %c0_i32_0, %c0_i32_1 : i32, i32, i32
  }
  func.func @transform_4(%arg0: i32) -> (i32, i32) {
    %c0_i32 = arith.constant 0 : i32
    %c0_i32_0 = arith.constant 0 : i32
    %c0_i32_1 = arith.constant 0 : i32
    return %c0_i32, %c0_i32_0 : i32, i32
  }
  func.func @transform_5(%arg0: i32) -> (i32, i32) {
    %c0_i32 = arith.constant 0 : i32
    %c0_i32_0 = arith.constant 0 : i32
    %c0_i32_1 = arith.constant 0 : i32
    return %c0_i32, %c0_i32_0 : i32, i32
  }
  func.func @transform_6(%arg0: i32) -> (i32, i32) {
    %c0_i32 = arith.constant 0 : i32
    %c0_i32_0 = arith.constant 0 : i32
    %c0_i32_1 = arith.constant 0 : i32
    return %c0_i32, %c0_i32_0 : i32, i32
  }
  func.func @transform_7(%arg0: i32) -> (i32, i32) {
    %c0_i32 = arith.constant 0 : i32
    %c0_i32_0 = arith.constant 0 : i32
    %c0_i32_1 = arith.constant 0 : i32
    return %c0_i32, %c0_i32_0 : i32, i32
  }
  func.func @transform_8(%arg0: i32) -> (i32, i32) {
    %c0_i32 = arith.constant 0 : i32
    %c0_i32_0 = arith.constant 0 : i32
    %c0_i32_1 = arith.constant 0 : i32
    return %c0_i32, %c0_i32_0 : i32, i32
  }
  func.func @transform_9(%arg0: i32) -> (i32, i32) {
    %c0_i32 = arith.constant 0 : i32
    %c0_i32_0 = arith.constant 0 : i32
    %c0_i32_1 = arith.constant 0 : i32
    return %c0_i32, %c0_i32_0 : i32, i32
  }
  func.func @transform_10(%arg0: i32) -> (i32, i32) {
    %c0_i32 = arith.constant 0 : i32
    %c0_i32_0 = arith.constant 0 : i32
    %c0_i32_1 = arith.constant 0 : i32
    return %c0_i32, %c0_i32_0 : i32, i32
  }
  func.func @transform_11(%arg0: i32) -> (i32, i32) {
    %c0_i32 = arith.constant 0 : i32
    %c0_i32_0 = arith.constant 0 : i32
    %c0_i32_1 = arith.constant 0 : i32
    return %c0_i32, %c0_i32_0 : i32, i32
  }
  func.func @transform_12(%arg0: i32) -> (i32, i32) {
    %c0_i32 = arith.constant 0 : i32
    %c0_i32_0 = arith.constant 0 : i32
    return %arg0, %c0_i32 : i32, i32
  }
}

</mosaic_0001>

<bundles_post_ra>
// kernel: tpu_custom_call.1
= control target key start
LH: loop header
LB: loop body
LE: loop exit
PB: predicated region body
PF: predicated region fallthrough
CT: control target
= control target key end

     0   :  { %s2725_s0 = inlined_call_operand.hbm [shape: f32[16,32], index: 0, kind: input, shape index: {}]   ;;  %s2726_s1 = inlined_call_operand.hbm [shape: f32[2,8,8], index: 1, kind: input, shape index: {}]   ;;  %s2727_s2 = inlined_call_operand.vmem [shape: f32[32,96], index: 2, kind: input, shape index: {}]   ;;  %s2728_s3 = inlined_call_operand.vmem [shape: f32[4,8,32], index: 3, kind: input, shape index: {}]   ;;  %s2729_s4 = inlined_call_operand.vmem [shape: f32[32,64], index: 4, kind: input, shape index: {}]   ;;  %s2730_s5 = inlined_call_operand.vmem [shape: f32[1,64], index: 5, kind: input, shape index: {}]   ;;  %s2731_s6 = inlined_call_operand.vmem [shape: f32[64,32], index: 6, kind: input, shape index: {}]   ;;  %s2732_s7 = inlined_call_operand.vmem [shape: f32[1,32], index: 7, kind: input, shape index: {}]   ;;  %s2733_s8 = inlined_call_operand.vmem [shape: f32[1,32], index: 8, kind: input, shape index: {}]   ;;  %s2734_s9 = inlined_call_operand.vmem [shape: f32[1,32], index: 9, kind: input, shape index: {}]   ;;  %s2735_s10 = inlined_call_operand.vmem [shape: f32[1,32], index: 10, kind: input, shape index: {}]   ;;  %s2736_s11 = inlined_call_operand.vmem [shape: f32[1,32], index: 11, kind: input, shape index: {}]   ;;  %s2737_s12 = inlined_call_operand.hbm [shape: f32[16,32], index: 12, kind: output, shape index: {}]  }
   0x1   :  { %2747 = sst [smem:[#allocation16_spill]] %s2725_s0 }
   0x2   :  { %17 = vsyncpa [#allocation3], 0 }
   0x3   :  { %19 = vsyncpa [#allocation3 + $0x1], 0 }
   0x4   :  { %20 = vsyncpa [#allocation6], 0 }
   0x5   :  { %22 = vsyncpa [#allocation6 + $0x1], 0 }
   0x6   :  { %23 = vsyncpa [#allocation4], 0 }
   0x7   :  { %25 = vsyncpa [#allocation4 + $0x1], 0  ;;  %s2342_s21 = smov 0   ;;  %s2344_s22 = smov 0  }
   0x8   :  { %s2346_s23 = smov 0   ;;  %s2348_s24 = smov 0  }
   0x9 LB: > { %2748 = sst [smem:[#allocation11_spill]] %s2260_s23  ;;  %s2363_s25 = sadd.s32 4294967295, %s2264_s24   ;;  %s2264_s24 = sphi %s2348_s24, %s2771_s24   ;;  %s2260_s23 = sphi %s2346_s23, %s2773_s23   ;;  %s2256_s22 = sphi %s2344_s22, %s2775_s22   ;;  %s2252_s21 = sphi %s2342_s21, %s2774_s21  }
   0xa   : > { %2749 = sst [smem:[#allocation12_spill]] %s2264_s24  ;;  %s1847_s26 = sadd.s32 4294967294, %s2264_s24  }
   0xb   : > { %s2367_s27 = sadd.s32 1, %s2264_s24   ;;  %s38_s28 = sadd.s32 1, %s2260_s23 }
   0xc   : > { %2750 = sst [smem:[#allocation13_spill]] %s2367_s27  ;;  %s35_s29 = ssub.s32 %s2264_s24, %s2367_s27 }
   0xd   : > { %p45_p0 = scmp.ne.s32.totalorder %s2260_s23, %s2256_s22  ;;  %p36_p1 = scmp.eq.s32.totalorder %s35_s29, 0 }
   0xe   : > { %p46_p2 = scmp.eq.s32.totalorder %s2264_s24, 0  ;;  %p51_p3 = scmp.ne.s32.totalorder %s2256_s22, %s2252_s21 }
   0xf   : > { %p52_p4 = scmp.eq.s32.totalorder %s2363_s25, 0  ;;  %p311_p7 = scmp.eq.s32.totalorder %s2363_s25, 1 }
  0x10   : > { %s2379_s30 = scalar_select %p36_p1, %s2260_s23, %s38_s28  }
  0x11   : > { %p2381_p5 = por %p46_p2, %p45_p0  ;;  %p2385_p6 = por %p52_p4, %p51_p3 }
  0x12   : > { %2751 = sst [smem:[#allocation14_spill]] %s2379_s30  ;;  %p317_p8 = scmp.eq.s32.totalorder %s1847_s26, 1 }
  0x13   : > { %s2753_s14 = scalar_select %p2385_p6, 1, 0 }
  0x14   : > { %p2072_p10 = scmp.lt.s32.totalorder %s2264_s24, 2  ;;  %p2392_p11 = por %p311_p7, %p45_p0 }
  0x15   : > { %p2396_p12 = por %p317_p8, %p51_p3  ;;  %s2401_s17 = sand.u32 1, %s2260_s23  }
  0x16   : > { %s2754_s15 = scalar_select %p2392_p11, 1, 0 }
  0x17   : > { %s2755_s16 = scalar_select %p2396_p12, 1, 0 }
  0x18   : > { %s2740_s18 = sshll.u32 %s2264_s24, 7  ;;  %s2739_s19 = sshll.u32 %s2401_s17, 3 }
  0x19   : > { %2756 = sst [smem:[#allocation15_spill]] %s2755_s16  ;;  %s2757_s0 = sld [smem:[#allocation16_spill]] }
  0x1a   : > { %s371_s29 = scalar_lea.vmem [#allocation2], %s2739_s19  ;;  %p2416_p13 = pnand %p2072_p10, %p2381_p5 }
  0x1b   : > { %s378_s30 = sshll.u32 %s371_s29, 4  ;;  %s368_s20 = scalar_lea.sflag [#allocation3], %s2401_s17  ;;  %s2420_s30 = int_to_ptr.vmem [resolvable:$true] %s378_s30 }
  0x1c   : > { %p2136_p3 = pneg %p2416_p13 }
  0x1f   : > { %s2410_s28 = scalar_lea.hbm %s2757_s0, %s2740_s18  ;;  %s2139_s19 = scalar_lea.hbm %s2757_s0, 256 }
  0x20   : > { %s2134_s26 = scalar_lea.hbm %s2410_s28, 128  ;;  %p2140_p5 = scmp.lt.u32.totalorder %s2410_s28, %s2757_s0 }
  0x21   : > { %p2135_p2 = scmp.ne.s32.totalorder %s2410_s28, %s2134_s26  ;;  %p2141_p8 = scmp.lt.u32.totalorder %s2139_s19, %s2134_s26 }
  0x22   : > { %p2143_p9 = scmp.lt.u32.totalorder %s2134_s26, %s2410_s28 }
  0x23   : > { %p2137_p4 = pnand %p2136_p3, %p2135_p2  ;;  %p2142_p10 = por %p2141_p8, %p2140_p5 }
  0x25   : > { %p2138_p7 = pneg %p2137_p4  ;;  %p2144_p0 = por %p2143_p9, %p2142_p10 }
  0x27   : > { %p2145_p1 = pnand %p2144_p0, %p2138_p7 }
  0x29   : > { %2148 = shalt.err (!%p2145_p1)
}
  0x2a   : > { %s2149_s16 = scalar_lea.vmem %s2420_s30, 128  ;;  %s2266_s13 = smov [#allocation2]  }
  0x2b   : > { %p2150_p2 = scmp.ne.s32.totalorder %s2420_s30, %s2149_s16  ;;  %s2154_s29 = sshll.u32 %s2266_s13, 4  ;;  %s2155_s29 = int_to_ptr.vmem [resolvable:$false] %s2154_s29 }
  0x2c   : > { %s2156_s27 = scalar_lea.vmem %s2155_s29, 256  ;;  %p2157_p11 = scmp.lt.s32.totalorder %s2420_s30, %s2155_s29 }
  0x2d   : > { %p2152_p4 = pnand %p2150_p2, %p2136_p3  ;;  %p2158_p5 = scmp.lt.s32.totalorder %s2156_s27, %s2149_s16 }
  0x2f   : > { %p2153_p12 = pneg %p2152_p4  ;;  %p2159_p8 = por %p2158_p5, %p2157_p11 }
  0x31   : > { %p2160_p9 = pnand %p2159_p8, %p2153_p12 }
  0x33   : > { %2163 = shalt.err (!%p2160_p9)
}
  0x34   : > { %2064 = dma.hbm_to_vmem [thread:$0]  (!%p2416_p13), %s2410_s28, 128, %s2420_s30, %s368_s20  }
  0x35   : > { %p2759_p0 = scmp.lt.s32.totalorder %s2264_s24, 3  ;;  %p2760_p1 = scmp.ge.s32.totalorder %s2264_s24, 1 }
  0x36   : > { %s2762_s16 = sshll.u32 %s2264_s24, 7  ;;  %s2763_s29 = sshll.u32 %s2401_s17, 3 }
  0x37   : > { %p2454_p7 = pnand %p2760_p1, %p2759_p0  ;;  %s2463_s13 = scalar_lea.hbm %s2726_s1, %s2762_s16 }
  0x38   : > { %s389_s27 = scalar_lea.vmem [#allocation5], %s2763_s29  ;;  %s386_s30 = scalar_lea.sflag [#allocation6], %s2401_s17 }
  0x39   : > { %s2761_s18 = scalar_select %p2454_p7, 1, 0 }
  0x3a   : > { %s396_s0 = sshll.u32 %s389_s27, 4  ;;  %s2164_s28 = scalar_lea.hbm %s2463_s13, 128  ;;  %s397_s0 = int_to_ptr.vmem [resolvable:$true] %s396_s0 }
  0x3b   : > { %p2165_p11 = scmp.ne.s32.totalorder %s2463_s13, %s2164_s28  ;;  %s2169_s16 = scalar_lea.hbm %s2726_s1, 256 }
  0x3c   : > { %p2170_p2 = scmp.lt.u32.totalorder %s2463_s13, %s2726_s1  ;;  %p2171_p4 = scmp.lt.u32.totalorder %s2169_s16, %s2164_s28 }
  0x3d   : > { %p2167_p12 = pnand %p2165_p11, %p2136_p3  ;;  %p2173_p8 = scmp.lt.u32.totalorder %s2164_s28, %s2463_s13 }
  0x3e   : > { %p2172_p5 = por %p2171_p4, %p2170_p2 }
  0x3f   : > { %p2168_p10 = pneg %p2167_p12 }
  0x40   : > { %p2174_p9 = por %p2173_p8, %p2172_p5 }
  0x42   : > { %p2175_p0 = pnand %p2174_p9, %p2168_p10 }
  0x44   : > { %2178 = shalt.err (!%p2175_p0)
}
  0x45   : > { %s2179_s17 = scalar_lea.vmem %s397_s0, 128  ;;  %s2267_s29 = smov [#allocation5]  }
  0x46   : > { %p2180_p1 = scmp.ne.s32.totalorder %s397_s0, %s2179_s17  ;;  %s2184_s24 = sshll.u32 %s2267_s29, 4  ;;  %s2185_s24 = int_to_ptr.vmem [resolvable:$false] %s2184_s24 }
  0x47   : > { %s2186_s27 = scalar_lea.vmem %s2185_s24, 256  ;;  %p2187_p6 = scmp.lt.s32.totalorder %s397_s0, %s2185_s24 }
  0x48   : > { %p2182_p11 = pnand %p2180_p1, %p2136_p3  ;;  %p2188_p7 = scmp.lt.s32.totalorder %s2186_s27, %s2179_s17 }
  0x4a   : > { %p2183_p12 = pneg %p2182_p11  ;;  %p2189_p2 = por %p2188_p7, %p2187_p6 }
  0x4c   : > { %p2190_p4 = pnand %p2189_p2, %p2183_p12 }
  0x4e   : > { %2193 = shalt.err (!%p2190_p4)
}
  0x4f   : > { %2067 = dma.hbm_to_vmem [thread:$0]  (!%p2416_p13), %s2463_s13, 128, %s397_s0, %s386_s30  }
  0x50   : > { %p2764_p10 = scmp.ne.s32.totalorder %s2761_s18, 0 }
  0x51   : > { %s2490_s28 = sand.u32 (!%p2764_p10), 1, %s2256_s22   ;;  %p2765_p6 = scmp.ne.s32.totalorder (!%p2764_p10), %s2753_s14, 0 }
  0x52   : > { %405 = sbr.rel (%p2764_p10) target bundleno = 2428 (0x97c), region = 68  ;;  %s2493_s20 = sshll.u32 (!%p2764_p10), %s2490_s28, 3 }
  0x53   : > { %s408_s16 = scalar_lea.sflag (!%p2764_p10), [#allocation3], %s2490_s28  ;;  %s411_s19 = scalar_lea.vmem (!%p2764_p10), [#allocation2], %s2493_s20 }
  0x59   : > { %2239 = dma.done.wait (%p2765_p6), %s408_s16, 128  }
  0x5a   : > { %2241 = vsyncadd (%p2765_p6), %s408_s16, 4294967168  ;;  %s417_s0 = scalar_lea.sflag [#allocation6], %s2490_s28  ;;  %s420_s23 = scalar_lea.vmem [#allocation5], %s2493_s20 }
  0x5b   : > { %2243 = dma.done.wait (%p2765_p6), %s417_s0, 128  }
  0x5c   : > { %2245 = vsyncadd (%p2765_p6), %s417_s0, 4294967168  ;;  %v2268_v0 = vmov 0.0|0.0   ;;  %vm2269_vm0 = vmmov 0   ;;  %v2270_v1 = vmov 0.0   ;;  %v467_v2 = vld [vmem:[%s2727_s2] sm:$0xff]  ;;  %v468_v3 = vld [vmem:[%s2727_s2 + $0x8] sm:$0xff] }
  0x5d   : > { %2031 = vmatprep.subr.bf16.mxu0 %v2268_v0  ;;  %1938 = vmatprep.mubr.msk.f32.mxu0 %vm2269_vm0, %v2270_v1  ;;  %v469_v4 = vld [vmem:[%s2727_s2 + $0x10] sm:$0xff]  ;;  %v2032_v5 = vpack.c.bf16 %v468_v3, %v467_v2  ;;  %v470_v6 = vld [vmem:[%s2727_s2 + $0x18] sm:$0xff]  ;;  %v2526_v8 = vld [vmem:[%s411_s19] sm:$0xff]  ;;  %vm471_vm1 = vcmask 261120   ;;  %s2271_s27 = smov 104   ;;  %s2272_s16 = smov 120  }
  0x5e   : > { %1946 = vmatprep.subr.mxu1 %v2270_v1  ;;  %1948 = vmatprep.mubr.msk.f32.mxu1 %vm2269_vm0, %v2270_v1  ;;  %v2035_v7 = vpack.c.bf16 %v470_v6, %v469_v4  ;;  %s2273_s0 = smov 96   ;;  %s2274_s18 = smov 112   ;;  %vm555_vm2 = vcmask 64512   ;;  %v552_v20 = vld [vmem:[%s420_s23] sm:$0xff]  ;;  %v1206_v56 = vld [vmem:[%s2728_s3] sm:$0xff]  ;;  %v1207_v60 = vld [vmem:[%s2728_s3 + $0x8] sm:$0xff] }
  0x5f   : > { %2033 = vmatpush3.bf16.msra.mxu0 %v2032_v5  ;;  %s2275_s19 = smov 64   ;;  %v1209_v4 = vld [vmem:[%s2728_s3 + $0x18] sm:$0xff]  ;;  %vm1635_vm3 = vcmask 523264   ;;  %s1884_s17 = sshll.u32 %s2363_s25, 7 }
  0x60   : > { %2034 = vmatprep.subr.bf16.mxu0 %v2268_v0  ;;  %s465_s29 = scalar_lea.vmem [#allocation7], %s2493_s20  ;;  %p2766_p3 = scmp.ne.s32.totalorder %s2754_s15, 0 }
  0x61   : > { %s1754_s24 = sshll.u32 %s465_s29, 4  ;;  %s2276_s25 = smov [#allocation7]   ;;  %s2682_s24 = int_to_ptr.vmem [resolvable:$true] %s1754_s24 }
  0x62   : > { %s2198_s20 = sshll.u32 %s2276_s25, 4  ;;  %s2199_s20 = int_to_ptr.vmem [resolvable:$false] %s2198_s20 }
  0x63   : > { %2036 = vmatpush3.bf16.msra.mxu0 %v2035_v7  ;;  %s2200_s23 = scalar_lea.vmem %s2199_s20, 256  ;;  %p2201_p8 = scmp.lt.s32.totalorder %s2682_s24, %s2199_s20 }
  0x64   : > { %1941 = vmatprep.subr.mxu0 %v2270_v1 }
  0x66   : > { %1939 = vmatmul.mubr.msk.f32.vlgmr.msra.gmra.mrb[0].mxu0 %vm471_vm1, %v2526_v8 }
  0x67   : > { %1943 = vmatprep.mubr.msk.f32.mxu0 %vm2269_vm0, %v2270_v1 }
 0x139   : > { %v541_v9 = vpop.f32.mrb[0].mxu0 }
 0x13a   : > { %550 = vrot.lane.b32.xlu1 %v541_v9, %s2271_s27  ;;  %546 = vrot.lane.b32.xlu0 %v541_v9, %s2272_s16  ;;  %v1940_v10 = vpop.f32.mrb[1].mxu0 }
 0x13e   : > { %553 = vrot.lane.b32.xlu1 %v541_v9, %s2273_s0  ;;  %548 = vrot.lane.b32.xlu0 %v541_v9, %s2274_s18  ;;  %s1741_s18 = scalar_lea.sflag [#allocation4], %s2490_s28 }
 0x1ac   : > { %v551_v11 = vpop.permute.xlu1 %550  ;;  %v547_v12 = vpop.permute.xlu0 %546 }
 0x1ad   : > { %630 = vrot.lane.b32.xlu0 %v547_v12, %s2273_s0 }
 0x1b0   : > { %v554_v13 = vpop.permute.xlu1 %553  ;;  %v549_v14 = vpop.permute.xlu0 %548 }
 0x1b1   : > { %1942 = vmatpush3.xpose.msk.msra.mxu0 %vm555_vm2, %v554_v13  ;;  %782 = vrot.lane.b32.xlu0 %v551_v11, %s2273_s0  ;;  %v1208_v13 = vld [vmem:[%s2728_s3 + $0x10] sm:$0xff] }
 0x1b2   : > { %706 = vrot.lane.b32.xlu1 %v549_v14, %s2273_s0  ;;  %1951 = vmatprep.subr.mxu0 %v2270_v1  ;;  %s2680_s0 = scalar_lea.hbm %s2737_s12, %s1884_s17 }
 0x1b4   : > { %1944 = vmatmul.mubr.msk.f32.vlgmr.msra.gmra.mrb[2].mxu0 %vm555_vm2, %v541_v9 }
 0x1b5   : > { %894 = vrot.lane.b32.xlu0 %v541_v9, %s2275_s19  ;;  %1953 = vmatprep.mubr.msk.f32.mxu0 %vm2269_vm0, %v2270_v1 }
 0x1b6   : > { %970 = vrot.lane.b32.xlu1 %v547_v12, %s2275_s19 }
 0x21f   : > { %v631_v15 = vpop.permute.xlu0 %630 }
 0x220   : > { %1947 = vmatpush3.xpose.msk.msra.mxu1 %vm555_vm2, %v631_v15 }
 0x221   : > { %1956 = vmatprep.subr.mxu1 %v2270_v1 }
 0x223   : > { %1949 = vmatmul.mubr.msk.f32.vlgmr.msra.gmra.mrb[0].mxu1 %vm555_vm2, %v547_v12  ;;  %v783_v16 = vpop.permute.xlu0 %782 }
 0x224   : > { %v707_v17 = vpop.permute.xlu1 %706  ;;  %1957 = vmatpush3.xpose.msk.msra.mxu1 %vm555_vm2, %v783_v16  ;;  %1958 = vmatprep.mubr.msk.f32.mxu1 %vm2269_vm0, %v2270_v1 }
 0x225   : > { %1952 = vmatpush3.xpose.msk.msra.mxu0 %vm555_vm2, %v707_v17  ;;  %1966 = vmatprep.subr.mxu1 %v2270_v1 }
 0x226   : > { %1961 = vmatprep.subr.mxu0 %v2270_v1 }
 0x227   : > { %1959 = vmatmul.mubr.msk.f32.vlgmr.msra.gmra.mrb[2].mxu1 %vm555_vm2, %v551_v11  ;;  %v895_v18 = vpop.permute.xlu0 %894 }
 0x228   : > { %1954 = vmatmul.mubr.msk.f32.vlgmr.msra.gmra.mrb[4].mxu0 %vm555_vm2, %v549_v14  ;;  %v971_v19 = vpop.permute.xlu1 %970  ;;  %1968 = vmatprep.mubr.msk.f32.mxu1 %vm2269_vm0, %v2270_v1 }
 0x229   : > { %1962 = vmatpush3.msra.mxu0 %v895_v18  ;;  %1967 = vmatpush3.msra.mxu1 %v971_v19 }
 0x22a   : > { %1963 = vmatprep.mubr.msk.f32.mxu0 %vm2269_vm0, %v2270_v1  ;;  %1971 = vmatprep.subr.mxu0 %v2270_v1 }
 0x22b   : > { %1976 = vmatprep.subr.mxu1 %v2270_v1 }
 0x287   : > { %v626_v21 = vpop.f32.mrb[2].mxu0 }
 0x288   : > { %v627_v22 = vadd.f32 %v626_v21, %v552_v20  ;;  %v1945_v23 = vpop.f32.mrb[3].mxu0 }
 0x28a   : > { %v858_v24 = vsel %vm555_vm2, %v627_v22, -inf }
 0x28b   : > { %859 = vmax.xlane.f32.xlu1 %v858_v24 }
 0x2f6   : > { %v702_v25 = vpop.f32.mrb[0].mxu1 }
 0x2f7   : > { %v703_v26 = vadd.f32 %v702_v25, %v552_v20  ;;  %v1950_v27 = vpop.f32.mrb[1].mxu1 }
 0x2f9   : > { %v861_v28 = vsel %vm555_vm2, %v703_v26, -inf }
 0x2fa   : > { %862 = vmax.xlane.f32.xlu0 %v861_v28  ;;  %v854_v29 = vpop.f32.mrb[2].mxu1 }
 0x2fb   : > { %v778_v30 = vpop.f32.mrb[4].mxu0  ;;  %v855_v31 = vadd.f32 %v854_v29, %v552_v20  ;;  %v1960_v32 = vpop.f32.mrb[3].mxu1 }
 0x2fc   : > { %v779_v33 = vadd.f32 %v778_v30, %v552_v20  ;;  %v1955_v34 = vpop.f32.mrb[5].mxu0 }
 0x2fd   : > { %v867_v35 = vsel %vm555_vm2, %v855_v31, -inf }
 0x2fe   : > { %868 = vmax.xlane.f32.xlu1 %v867_v35  ;;  %v864_v36 = vsel %vm555_vm2, %v779_v33, -inf }
 0x2ff   : > { %865 = vmax.xlane.f32.xlu0 %v864_v36 }
 0x30f   : > { %1046 = vrot.lane.b32.xlu1 %v549_v14, %s2275_s19 }
 0x315   : > { %1122 = vrot.lane.b32.xlu0 %v551_v11, %s2275_s19  ;;  %s2194_s19 = scalar_lea.vmem %s2682_s24, 128 }
 0x316   : > { %p2195_p13 = scmp.ne.s32.totalorder %s2682_s24, %s2194_s19  ;;  %p2202_p9 = scmp.lt.s32.totalorder %s2200_s23, %s2194_s19 }
 0x318   : > { %v860_v37 = vpop.xlane.xlu1 %859  ;;  %p2196_p7 = pnand %p2195_p13, %p2766_p3  ;;  %p2203_p0 = por %p2202_p9, %p2201_p8 }
 0x319   : > { %v870_v38 = vsub.f32 %v627_v22, %v860_v37 }
 0x31a   : > { %p2197_p5 = pneg %p2196_p7 }
 0x31b   : > { %v874_v39 = vmul.f32 1.442695, %v870_v38 }
 0x31c   : > { %p2204_p1 = pnand %p2203_p0, %p2197_p5 }
 0x31d   : > { %2114 = vpow2.f32 %v874_v39  ;;  %v1535_v39 = vld [vmem:[%s2729_s4] sm:$0xff] }
 0x327   : > { %v2115_v40 = vpop.eup %2114 }
 0x328   : > { %1964 = vmatmul.mubr.msk.f32.vlgmr.msra.gmra.mrb[6].mxu0 %vm555_vm2, %v2115_v40  ;;  %v882_v41 = vsel %vm555_vm2, %v2115_v40, 0.0  ;;  %v1536_v40 = vld [vmem:[%s2729_s4 + $0x8] sm:$0xff] }
 0x329   : > { %1973 = vmatprep.mubr.msk.f32.mxu0 %vm2269_vm0, %v2270_v1 }
 0x334   : > { %883 = vadd.xlane.f32.xlu0 %v882_v41  ;;  %v2038_v41 = vpack.c.bf16 %v1536_v40, %v1535_v39 }
 0x387   : > { %v863_v42 = vpop.xlane.xlu0 %862 }
 0x388   : > { %v871_v43 = vsub.f32 %v703_v26, %v863_v42  ;;  %v1538_v42 = vld [vmem:[%s2729_s4 + $0x18] sm:$0xff] }
 0x38a   : > { %v876_v44 = vmul.f32 1.442695, %v871_v43 }
 0x38b   : > { %v869_v45 = vpop.xlane.xlu1 %868 }
 0x38c   : > { %2116 = vpow2.f32 %v876_v44  ;;  %v873_v46 = vsub.f32 %v855_v31, %v869_v45  ;;  %v866_v47 = vpop.xlane.xlu0 %865  ;;  %v1620_v44 = vld [vmem:[%s2731_s6] sm:$0xff]  ;;  %v1621_v45 = vld [vmem:[%s2731_s6 + $0x8] sm:$0xff] }
 0x38d   : > { %v872_v48 = vsub.f32 %v779_v33, %v866_v47  ;;  %v2044_v47 = vpack.c.bf16 %v1621_v45, %v1620_v44 }
 0x38e   : > { %v880_v49 = vmul.f32 1.442695, %v873_v46  ;;  %v1622_v46 = vld [vmem:[%s2731_s6 + $0x10] sm:$0xff] }
 0x38f   : > { %v878_v50 = vmul.f32 1.442695, %v872_v48  ;;  %v1047_v51 = vpop.permute.xlu1 %1046  ;;  %v1623_v48 = vld [vmem:[%s2731_s6 + $0x18] sm:$0xff] }
 0x390   : > { %2118 = vpow2.f32 %v880_v49  ;;  %1972 = vmatpush3.msra.mxu0 %v1047_v51  ;;  %v1123_v53 = vpop.permute.xlu0 %1122  ;;  %v2047_v49 = vpack.c.bf16 %v1623_v48, %v1622_v46  ;;  %v1625_v51 = vld [vmem:[%s2731_s6 + $0x28] sm:$0xff] }
 0x391   : > { %2120 = vpow2.f32 %v878_v50  ;;  %1981 = vmatprep.subr.mxu0 %v2270_v1  ;;  %v1624_v50 = vld [vmem:[%s2731_s6 + $0x20] sm:$0xff] }
 0x396   : > { %v2117_v52 = vpop.eup %2116 }
 0x397   : > { %1969 = vmatmul.mubr.msk.f32.vlgmr.msra.gmra.mrb[4].mxu1 %vm555_vm2, %v2117_v52  ;;  %v885_v54 = vsel %vm555_vm2, %v2117_v52, 0.0  ;;  %v2050_v52 = vpack.c.bf16 %v1625_v51, %v1624_v50 }
 0x398   : > { %1977 = vmatpush3.msra.mxu1 %v1123_v53  ;;  %886 = vadd.xlane.f32.xlu1 %v885_v54 }
 0x399   : > { %1978 = vmatprep.mubr.msk.f32.mxu1 %vm2269_vm0, %v2270_v1  ;;  %1986 = vmatprep.subr.mxu1 %v2270_v1 }
 0x39a   : > { %v2119_v55 = vpop.eup %2118 }
 0x39b   : > { %v2121_v57 = vpop.eup %2120  ;;  %1979 = vmatmul.mubr.msk.f32.vlgmr.msra.gmra.mrb[6].mxu1 %vm555_vm2, %v2119_v55  ;;  %v891_v58 = vsel %vm555_vm2, %v2119_v55, 0.0 }
 0x39c   : > { %1974 = vmatmul.mubr.msk.f32.vlgmr.msra.gmra.mrb[8].mxu0 %vm555_vm2, %v2121_v57  ;;  %892 = vadd.xlane.f32.xlu1 %v891_v58  ;;  %v888_v59 = vsel %vm555_vm2, %v2121_v57, 0.0  ;;  %v1875_v57 = vld [vmem:[%s2733_s8] ss:$0 sm:$0xff] }
 0x39d   : > { %889 = vadd.xlane.f32.xlu0 %v888_v59  ;;  %1987 = vmatpush3.msra.mxu1 %v1206_v56  ;;  %v1876_v59 = vld [vmem:[%s2734_s9] ss:$0 sm:$0xff] }
 0x39e   : > { %1988 = vmatprep.mubr.msk.f32.mxu1 %vm2269_vm0, %v2270_v1  ;;  %1983 = vmatprep.mubr.msk.f32.mxu0 %vm2269_vm0, %v2270_v1 }
 0x39f   : > { %1996 = vmatprep.subr.mxu1 %v2270_v1  ;;  %1982 = vmatpush3.msra.mxu0 %v1207_v60 }
 0x3a0   : > { %1991 = vmatprep.subr.mxu0 %v2270_v1 }
 0x3c1   : > { %v884_v61 = vpop.xlane.xlu0 %883 }
 0x3c2   : > { %2122 = vrcp.f32 %v884_v61 }
 0x3cc   : > { %v2123_v62 = vpop.eup %2122 }
 0x3fb   : > { %v966_v63 = vpop.f32.mrb[6].mxu0 }
 0x3fc   : > { %v1202_v2 = vmul.f32 %v2123_v62, %v966_v63  ;;  %v1965_v3 = vpop.f32.mrb[7].mxu0  ;;  %v1627_v62 = vld [vmem:[%s2731_s6 + $0x38] sm:$0xff] }
 0x3fe   : > { %1989 = vmatmul.mubr.msk.f32.vlgmr.msra.gmra.mrb[8].mxu1 %vm555_vm2, %v1202_v2  ;;  %v1877_v2 = vld [vmem:[%s2730_s5] ss:$0 sm:$0xff] }
 0x3ff   : > { %1997 = vmatpush3.msra.mxu1 %v1209_v4  ;;  %1998 = vmatprep.mubr.msk.f32.mxu1 %vm2269_vm0, %v2270_v1 }
 0x400   : > { %2043 = vmatprep.subr.bf16.mxu1 %v2268_v0 }
 0x425   : > { %v887_v5 = vpop.xlane.xlu1 %886 }
 0x426   : > { %2124 = vrcp.f32 %v887_v5 }
 0x429   : > { %v893_v6 = vpop.xlane.xlu1 %892 }
 0x42a   : > { %v890_v7 = vpop.xlane.xlu0 %889  ;;  %2126 = vrcp.f32 %v893_v6 }
 0x42b   : > { %2128 = vrcp.f32 %v890_v7  ;;  %v1879_v7 = vld [vmem:[%s2732_s7] ss:$0 sm:$0xff] }
 0x430   : > { %v2125_v9 = vpop.eup %2124 }
 0x434   : > { %v2127_v14 = vpop.eup %2126 }
 0x435   : > { %v2129_v16 = vpop.eup %2128 }
 0x46a   : > { %v1042_v10 = vpop.f32.mrb[4].mxu1 }
 0x46b   : > { %v1203_v11 = vmul.f32 %v2125_v9, %v1042_v10  ;;  %v1970_v12 = vpop.f32.mrb[5].mxu1 }
 0x46d   : > { %1984 = vmatmul.mubr.msk.f32.vlgmr.msra.gmra.mrb[10].mxu0 %vm555_vm2, %v1203_v11 }
 0x46e   : > { %v1194_v15 = vpop.f32.mrb[6].mxu1  ;;  %1992 = vmatpush3.msra.mxu0 %v1208_v13  ;;  %1993 = vmatprep.mubr.msk.f32.mxu0 %vm2269_vm0, %v2270_v1 }
 0x46f   : > { %v1118_v17 = vpop.f32.mrb[8].mxu0  ;;  %v1205_v18 = vmul.f32 %v2127_v14, %v1194_v15  ;;  %v1980_v19 = vpop.f32.mrb[7].mxu1  ;;  %2037 = vmatprep.subr.bf16.mxu0 %v2268_v0 }
 0x470   : > { %v1204_v20 = vmul.f32 %v2129_v16, %v1118_v17  ;;  %v1975_v21 = vpop.f32.mrb[9].mxu0 }
 0x471   : > { %1999 = vmatmul.mubr.msk.f32.vlgmr.msra.gmra.mrb[10].mxu1 %vm555_vm2, %v1205_v18 }
 0x472   : > { %1994 = vmatmul.mubr.msk.f32.vlgmr.msra.gmra.mrb[12].mxu0 %vm555_vm2, %v1204_v20  ;;  %2028 = vmatprep.mubr.msk.f32.mxu1 %vm2269_vm0, %v2270_v1 }
 0x473   : > { %2009 = vmatprep.mubr.msk.f32.mxu0 %vm2269_vm0, %v2270_v1  ;;  %2039 = vmatpush3.bf16.msra.mxu0 %v2038_v41 }
 0x474   : > { %2040 = vmatprep.subr.bf16.mxu0 %v2268_v0  ;;  %2045 = vmatpush3.bf16.msra.mxu1 %v2044_v47 }
 0x475   : > { %2046 = vmatprep.subr.bf16.mxu1 %v2268_v0 }
 0x478   : > { %2048 = vmatpush3.bf16.msra.mxu1 %v2047_v49 }
 0x479   : > { %2049 = vmatprep.subr.bf16.mxu1 %v2268_v0 }
 0x47c   : > { %2051 = vmatpush3.bf16.msra.mxu1 %v2050_v52 }
 0x47d   : > { %2052 = vmatprep.subr.bf16.mxu1 %v2268_v0  ;;  %v1626_v0 = vld [vmem:[%s2731_s6 + $0x30] sm:$0xff] }
 0x47e   : > { %v2053_v63 = vpack.c.bf16 %v1627_v62, %v1626_v0 }
 0x480   : > { %2054 = vmatpush3.bf16.msra.mxu1 %v2053_v63 }
 0x4d1   : > { %v1352_v22 = vpop.f32.mrb[8].mxu1 }
 0x4d2   : > { %v1990_v23 = vpop.f32.mrb[9].mxu1 }
 0x4d3   : > { %v1881_v23 = vld [vmem:[%s2735_s10] ss:$0 sm:$0xff] }
 0x540   : > { %v1279_v24 = vpop.f32.mrb[10].mxu0 }
 0x541   : > { %v1353_v25 = vadd.f32 %v1352_v22, %v1279_v24  ;;  %v1985_v26 = vpop.f32.mrb[11].mxu0 }
 0x544   : > { %v1499_v27 = vpop.f32.mrb[10].mxu1 }
 0x545   : > { %v1425_v28 = vpop.f32.mrb[12].mxu0  ;;  %v2000_v29 = vpop.f32.mrb[11].mxu1 }
 0x546   : > { %v1429_v30 = vadd.f32 %v1425_v28, %v1353_v25  ;;  %v1995_v31 = vpop.f32.mrb[13].mxu0  ;;  %v1882_v25 = vld [vmem:[%s2736_s11] ss:$0 sm:$0xff] }
 0x548   : > { %v1503_v32 = vadd.f32 %v1499_v27, %v1429_v30 }
 0x54a   : > { %v1504_v33 = vadd.f32 %v1503_v32, %v2526_v8  ;;  %v1537_v8 = vld [vmem:[%s2729_s4 + $0x10] sm:$0xff] }
 0x54b   : > { %v2041_v43 = vpack.c.bf16 %v1538_v42, %v1537_v8 }
 0x54c   : > { %v1507_v34 = vsel %vm471_vm1, %v1504_v33, 0.0 }
 0x54d   : > { %1508 = vadd.xlane.f32.xlu0 %v1507_v34  ;;  %2042 = vmatpush3.bf16.msra.mxu0 %v2041_v43 }
 0x5da   : > { %v1509_v35 = vpop.xlane.xlu0 %1508 }
 0x5db   : > { %v1511_v36 = vmul.f32 0.03125, %v1509_v35 }
 0x5dd   : > { %v1512_v37 = vsub.f32 %v1504_v33, %v1511_v36 }
 0x5df   : > { %v1513_v1 = vmul.f32 %v1512_v37, %v1512_v37 }
 0x5e1   : > { %v1514_v38 = vsel %vm471_vm1, %v1513_v1, 0.0 }
 0x5e2   : > { %1515 = vadd.xlane.f32.xlu1 %v1514_v38 }
 0x66f   : > { %v1516_v53 = vpop.xlane.xlu1 %1515 }
 0x670   : > { %v1517_v54 = vmul.f32 0.03125, %v1516_v53 }
 0x672   : > { %v1518_v55 = vadd.f32 1e-06, %v1517_v54 }
 0x674   : > { %2130 = vrsqrt.f32 %v1518_v55 }
 0x67e   : > { %v2131_v56 = vpop.eup %2130 }
 0x67f   : > { %v1520_v58 = vmul.f32 %v2131_v56, %v1512_v37 }
 0x681   : > { %v1527_v60 = vmul.f32 %v1875_v57, %v1520_v58 }
 0x683   : > { %v1534_v61 = vadd.f32 %v1876_v59, %v1527_v60 }
 0x685   : > { %2010 = vmatmul.mubr.msk.f32.vlgmr.msra.gmra.mrb[14].mxu0 %vm471_vm1, %v1534_v61 }
 0x758   : > { %v1615_v3 = vpop.f32.mrb[14].mxu0 }
 0x759   : > { %v1616_v4 = vadd.f32 %v1877_v2, %v1615_v3  ;;  %v2011_v5 = vpop.f32.mrb[15].mxu0 }
 0x75b   : > { %v1619_v6 = vmax.f32 %v1616_v4, 0.0 }
 0x75d   : > { %2029 = vmatmul.mubr.msk.f32.vlgmr.msra.gmra.mrb[12].mxu1 %vm1635_vm3, %v1619_v6 }
 0x830   : > { %v1705_v9 = vpop.f32.mrb[12].mxu1 }
 0x831   : > { %v1706_v10 = vadd.f32 %v1879_v7, %v1705_v9  ;;  %v2030_v11 = vpop.f32.mrb[13].mxu1 }
 0x833   : > { %v1709_v12 = vadd.f32 %v1706_v10, %v1534_v61 }
 0x835   : > { %v1712_v13 = vsel %vm471_vm1, %v1709_v12, 0.0 }
 0x836   : > { %1713 = vadd.xlane.f32.xlu0 %v1712_v13 }
 0x8c3   : > { %v1714_v14 = vpop.xlane.xlu0 %1713 }
 0x8c4   : > { %v1715_v15 = vmul.f32 0.03125, %v1714_v14 }
 0x8c6   : > { %v1716_v16 = vsub.f32 %v1709_v12, %v1715_v15 }
 0x8c8   : > { %v1717_v17 = vmul.f32 %v1716_v16, %v1716_v16 }
 0x8ca   : > { %v1718_v18 = vsel %vm471_vm1, %v1717_v17, 0.0 }
 0x8cb   : > { %1719 = vadd.xlane.f32.xlu1 %v1718_v18 }
 0x958   : > { %v1720_v19 = vpop.xlane.xlu1 %1719 }
 0x959   : > { %v1721_v20 = vmul.f32 0.03125, %v1720_v19 }
 0x95b   : > { %v1722_v21 = vadd.f32 1e-06, %v1721_v20 }
 0x95d   : > { %2132 = vrsqrt.f32 %v1722_v21 }
 0x967   : > { %v2133_v22 = vpop.eup %2132 }
 0x968   : > { %v1724_v24 = vmul.f32 %v2133_v22, %v1716_v16 }
 0x96a   : > { %v1731_v26 = vmul.f32 %v1881_v23, %v1724_v24 }
 0x96c   : > { %v1738_v27 = vadd.f32 %v1882_v25, %v1731_v26 }
 0x96e   : > { %1739 = vst.msk [vmem:[%s465_s29] sm:$0xff] %vm471_vm1, %v1738_v27 }
 0x96f   : > { %2207 = shalt.err (!%p2204_p1)
}
 0x970   : > { %s2208_s28 = scalar_lea.hbm %s2680_s0, 128  ;;  %s2212_s14 = scalar_lea.hbm %s2737_s12, 256 }
 0x971   : > { %p2209_p11 = scmp.ne.s32.totalorder %s2680_s0, %s2208_s28  ;;  %p2213_p4 = scmp.lt.u32.totalorder %s2680_s0, %s2737_s12 }
 0x972   : > { %p2214_p10 = scmp.lt.u32.totalorder %s2212_s14, %s2208_s28  ;;  %p2216_p13 = scmp.lt.u32.totalorder %s2208_s28, %s2680_s0 }
 0x973   : > { %p2210_p12 = pnand %p2209_p11, %p2766_p3 }
 0x974   : > { %p2215_p6 = por %p2214_p10, %p2213_p4 }
 0x975   : > { %p2211_p2 = pneg %p2210_p12 }
 0x976   : > { %p2217_p7 = por %p2216_p13, %p2215_p6 }
 0x978   : > { %p2218_p5 = pnand %p2217_p7, %p2211_p2 }
 0x97a   : > { %2221 = shalt.err (!%p2218_p5)
}
 0x97b   : > { %2059 = dma.vmem_to_hbm [thread:$0]  (%p2766_p3), %s2682_s24, 128, %s2680_s0, %s1741_s18  }
 0x97c PF: > { %s2767_s29 = sld [smem:[#allocation15_spill]]  ;;  %s2768_s27 = sld [smem:[#allocation12_spill]] }
 0x97d   : > { %s1766_s16 = sand.u32 1, %s2252_s21  }
 0x97e   : > { %s1767_s19 = scalar_lea.sflag [#allocation4], %s1766_s16 }
 0x982   : > { %p2769_p8 = scmp.ne.s32.totalorder %s2767_s29, 0  ;;  %p2770_p9 = scmp.ge.s32.totalorder %s2768_s27, 2 }
 0x984   : > { %p2069_p0 = pnand %p2770_p9, %p2769_p8 }
 0x986   : > { %2247 = dma.done.wait (!%p2069_p0), %s1767_s19, 128  }
 0x987   : > { %2249 = vsyncadd (!%p2069_p0), %s1767_s19, 4294967168  ;;  %s2771_s24 = sld [smem:[#allocation13_spill]]  ;;  %s2772_s25 = sld [smem:[#allocation11_spill]] }
 0x988   : > { %s2773_s23 = sld [smem:[#allocation14_spill]]  ;;  %s2774_s21 = smov %s2256_s22 }
 0x98d   : > { %p28_p1 = scmp.ge.s32.totalorder %s2771_s24, 4   ;;  %s2775_s22 = smov %s2772_s25 }
 0x98f   :  { %30 = sbr.rel (!%p28_p1) target bundleno = 9 (0x9), region = 126 }
 0x996   :  { %1772 = vsyncpa [#allocation3], 1 }
 0x997   :  { %1774 = vsyncpa [#allocation3 + $0x1], 1 }
 0x998   :  { %1775 = vsyncpa [#allocation6], 1 }
 0x999   :  { %1777 = vsyncpa [#allocation6 + $0x1], 1 }
 0x99a   :  { %1778 = vsyncpa [#allocation4], 1 }
 0x99b   :  { %1780 = vsyncpa [#allocation4 + $0x1], 1 }

// kernel: tpu_custom_call.1
= control target key start
LH: loop header
LB: loop body
LE: loop exit
PB: predicated region body
PF: predicated region fallthrough
CT: control target
= control target key end

     0   :  { %s2725_s0 = inlined_call_operand.hbm [shape: f32[16,32], index: 0, kind: input, shape index: {}]   ;;  %s2726_s1 = inlined_call_operand.hbm [shape: f32[2,8,8], index: 1, kind: input, shape index: {}]   ;;  %s2727_s2 = inlined_call_operand.vmem [shape: f32[32,96], index: 2, kind: input, shape index: {}]   ;;  %s2728_s3 = inlined_call_operand.vmem [shape: f32[4,8,32], index: 3, kind: input, shape index: {}]   ;;  %s2729_s4 = inlined_call_operand.vmem [shape: f32[32,64], index: 4, kind: input, shape index: {}]   ;;  %s2730_s5 = inlined_call_operand.vmem [shape: f32[1,64], index: 5, kind: input, shape index: {}]   ;;  %s2731_s6 = inlined_call_operand.vmem [shape: f32[64,32], index: 6, kind: input, shape index: {}]   ;;  %s2732_s7 = inlined_call_operand.vmem [shape: f32[1,32], index: 7, kind: input, shape index: {}]   ;;  %s2733_s8 = inlined_call_operand.vmem [shape: f32[1,32], index: 8, kind: input, shape index: {}]   ;;  %s2734_s9 = inlined_call_operand.vmem [shape: f32[1,32], index: 9, kind: input, shape index: {}]   ;;  %s2735_s10 = inlined_call_operand.vmem [shape: f32[1,32], index: 10, kind: input, shape index: {}]   ;;  %s2736_s11 = inlined_call_operand.vmem [shape: f32[1,32], index: 11, kind: input, shape index: {}]   ;;  %s2737_s12 = inlined_call_operand.hbm [shape: f32[16,32], index: 12, kind: output, shape index: {}]  }
   0x1   :  { %2747 = sst [smem:[#allocation16_spill]] %s2725_s0 }
   0x2   :  { %17 = vsyncpa [#allocation3], 0 }
   0x3   :  { %19 = vsyncpa [#allocation3 + $0x1], 0 }
   0x4   :  { %20 = vsyncpa [#allocation6], 0 }
   0x5   :  { %22 = vsyncpa [#allocation6 + $0x1], 0 }
   0x6   :  { %23 = vsyncpa [#allocation4], 0 }
   0x7   :  { %25 = vsyncpa [#allocation4 + $0x1], 0  ;;  %s2342_s21 = smov 0   ;;  %s2344_s22 = smov 0  }
   0x8   :  { %s2346_s23 = smov 0   ;;  %s2348_s24 = smov 0  }
   0x9 LB: > { %2748 = sst [smem:[#allocation11_spill]] %s2260_s23  ;;  %s2363_s25 = sadd.s32 4294967295, %s2264_s24   ;;  %s2264_s24 = sphi %s2348_s24, %s2771_s24   ;;  %s2260_s23 = sphi %s2346_s23, %s2773_s23   ;;  %s2256_s22 = sphi %s2344_s22, %s2775_s22   ;;  %s2252_s21 = sphi %s2342_s21, %s2774_s21  }
   0xa   : > { %2749 = sst [smem:[#allocation12_spill]] %s2264_s24  ;;  %s1847_s26 = sadd.s32 4294967294, %s2264_s24  }
   0xb   : > { %s2367_s27 = sadd.s32 1, %s2264_s24   ;;  %s38_s28 = sadd.s32 1, %s2260_s23 }
   0xc   : > { %2750 = sst [smem:[#allocation13_spill]] %s2367_s27  ;;  %s35_s29 = ssub.s32 %s2264_s24, %s2367_s27 }
   0xd   : > { %p45_p0 = scmp.ne.s32.totalorder %s2260_s23, %s2256_s22  ;;  %p36_p1 = scmp.eq.s32.totalorder %s35_s29, 0 }
   0xe   : > { %p46_p2 = scmp.eq.s32.totalorder %s2264_s24, 0  ;;  %p51_p3 = scmp.ne.s32.totalorder %s2256_s22, %s2252_s21 }
   0xf   : > { %p52_p4 = scmp.eq.s32.totalorder %s2363_s25, 0  ;;  %p311_p7 = scmp.eq.s32.totalorder %s2363_s25, 1 }
  0x10   : > { %s2379_s30 = scalar_select %p36_p1, %s2260_s23, %s38_s28  }
  0x11   : > { %p2381_p5 = por %p46_p2, %p45_p0  ;;  %p2385_p6 = por %p52_p4, %p51_p3 }
  0x12   : > { %2751 = sst [smem:[#allocation14_spill]] %s2379_s30  ;;  %p317_p8 = scmp.eq.s32.totalorder %s1847_s26, 1 }
  0x13   : > { %s2753_s14 = scalar_select %p2385_p6, 1, 0 }
  0x14   : > { %p2072_p10 = scmp.lt.s32.totalorder %s2264_s24, 2  ;;  %p2392_p11 = por %p311_p7, %p45_p0 }
  0x15   : > { %p2396_p12 = por %p317_p8, %p51_p3  ;;  %s2401_s17 = sand.u32 1, %s2260_s23  }
  0x16   : > { %s2754_s15 = scalar_select %p2392_p11, 1, 0 }
  0x17   : > { %s2755_s16 = scalar_select %p2396_p12, 1, 0 }
  0x18   : > { %s2740_s18 = sshll.u32 %s2264_s24, 7  ;;  %s2739_s19 = sshll.u32 %s2401_s17, 3 }
  0x19   : > { %2756 = sst [smem:[#allocation15_spill]] %s2755_s16  ;;  %s2757_s0 = sld [smem:[#allocation16_spill]] }
  0x1a   : > { %s371_s29 = scalar_lea.vmem [#allocation2], %s2739_s19  ;;  %p2416_p13 = pnand %p2072_p10, %p2381_p5 }
  0x1b   : > { %s378_s30 = sshll.u32 %s371_s29, 4  ;;  %s368_s20 = scalar_lea.sflag [#allocation3], %s2401_s17  ;;  %s2420_s30 = int_to_ptr.vmem [resolvable:$true] %s378_s30 }
  0x1c   : > { %p2136_p3 = pneg %p2416_p13 }
  0x1f   : > { %s2410_s28 = scalar_lea.hbm %s2757_s0, %s2740_s18  ;;  %s2139_s19 = scalar_lea.hbm %s2757_s0, 256 }
  0x20   : > { %s2134_s26 = scalar_lea.hbm %s2410_s28, 128  ;;  %p2140_p5 = scmp.lt.u32.totalorder %s2410_s28, %s2757_s0 }
  0x21   : > { %p2135_p2 = scmp.ne.s32.totalorder %s2410_s28, %s2134_s26  ;;  %p2141_p8 = scmp.lt.u32.totalorder %s2139_s19, %s2134_s26 }
  0x22   : > { %p2143_p9 = scmp.lt.u32.totalorder %s2134_s26, %s2410_s28 }
  0x23   : > { %p2137_p4 = pnand %p2136_p3, %p2135_p2  ;;  %p2142_p10 = por %p2141_p8, %p2140_p5 }
  0x25   : > { %p2138_p7 = pneg %p2137_p4  ;;  %p2144_p0 = por %p2143_p9, %p2142_p10 }
  0x27   : > { %p2145_p1 = pnand %p2144_p0, %p2138_p7 }
  0x29   : > { %2148 = shalt.err (!%p2145_p1)
}
  0x2a   : > { %s2149_s16 = scalar_lea.vmem %s2420_s30, 128  ;;  %s2266_s13 = smov [#allocation2]  }
  0x2b   : > { %p2150_p2 = scmp.ne.s32.totalorder %s2420_s30, %s2149_s16  ;;  %s2154_s29 = sshll.u32 %s2266_s13, 4  ;;  %s2155_s29 = int_to_ptr.vmem [resolvable:$false] %s2154_s29 }
  0x2c   : > { %s2156_s27 = scalar_lea.vmem %s2155_s29, 256  ;;  %p2157_p11 = scmp.lt.s32.totalorder %s2420_s30, %s2155_s29 }
  0x2d   : > { %p2152_p4 = pnand %p2150_p2, %p2136_p3  ;;  %p2158_p5 = scmp.lt.s32.totalorder %s2156_s27, %s2149_s16 }
  0x2f   : > { %p2153_p12 = pneg %p2152_p4  ;;  %p2159_p8 = por %p2158_p5, %p2157_p11 }
  0x31   : > { %p2160_p9 = pnand %p2159_p8, %p2153_p12 }
  0x33   : > { %2163 = shalt.err (!%p2160_p9)
}
  0x34   : > { %2064 = dma.hbm_to_vmem [thread:$0]  (!%p2416_p13), %s2410_s28, 128, %s2420_s30, %s368_s20  }
  0x35   : > { %p2759_p0 = scmp.lt.s32.totalorder %s2264_s24, 3  ;;  %p2760_p1 = scmp.ge.s32.totalorder %s2264_s24, 1 }
  0x36   : > { %s2762_s16 = sshll.u32 %s2264_s24, 7  ;;  %s2763_s29 = sshll.u32 %s2401_s17, 3 }
  0x37   : > { %p2454_p7 = pnand %p2760_p1, %p2759_p0  ;;  %s2463_s13 = scalar_lea.hbm %s2726_s1, %s2762_s16 }
  0x38   : > { %s389_s27 = scalar_lea.vmem [#allocation5], %s2763_s29  ;;  %s386_s30 = scalar_lea.sflag [#allocation6], %s2401_s17 }
  0x39   : > { %s2761_s18 = scalar_select %p2454_p7, 1, 0 }
  0x3a   : > { %s396_s0 = sshll.u32 %s389_s27, 4  ;;  %s2164_s28 = scalar_lea.hbm %s2463_s13, 128  ;;  %s397_s0 = int_to_ptr.vmem [resolvable:$true] %s396_s0 }
  0x3b   : > { %p2165_p11 = scmp.ne.s32.totalorder %s2463_s13, %s2164_s28  ;;  %s2169_s16 = scalar_lea.hbm %s2726_s1, 256 }
  0x3c   : > { %p2170_p2 = scmp.lt.u32.totalorder %s2463_s13, %s2726_s1  ;;  %p2171_p4 = scmp.lt.u32.totalorder %s2169_s16, %s2164_s28 }
  0x3d   : > { %p2167_p12 = pnand %p2165_p11, %p2136_p3  ;;  %p2173_p8 = scmp.lt.u32.totalorder %s2164_s28, %s2463_s13 }
  0x3e   : > { %p2172_p5 = por %p2171_p4, %p2170_p2 }
  0x3f   : > { %p2168_p10 = pneg %p2167_p12 }
  0x40   : > { %p2174_p9 = por %p2173_p8, %p2172_p5 }
  0x42   : > { %p2175_p0 = pnand %p2174_p9, %p2168_p10 }
  0x44   : > { %2178 = shalt.err (!%p2175_p0)
}
  0x45   : > { %s2179_s17 = scalar_lea.vmem %s397_s0, 128  ;;  %s2267_s29 = smov [#allocation5]  }
  0x46   : > { %p2180_p1 = scmp.ne.s32.totalorder %s397_s0, %s2179_s17  ;;  %s2184_s24 = sshll.u32 %s2267_s29, 4  ;;  %s2185_s24 = int_to_ptr.vmem [resolvable:$false] %s2184_s24 }
  0x47   : > { %s2186_s27 = scalar_lea.vmem %s2185_s24, 256  ;;  %p2187_p6 = scmp.lt.s32.totalorder %s397_s0, %s2185_s24 }
  0x48   : > { %p2182_p11 = pnand %p2180_p1, %p2136_p3  ;;  %p2188_p7 = scmp.lt.s32.totalorder %s2186_s27, %s2179_s17 }
  0x4a   : > { %p2183_p12 = pneg %p2182_p11  ;;  %p2189_p2 = por %p2188_p7, %p2187_p6 }
  0x4c   : > { %p2190_p4 = pnand %p2189_p2, %p2183_p12 }
  0x4e   : > { %2193 = shalt.err (!%p2190_p4)
}
  0x4f   : > { %2067 = dma.hbm_to_vmem [thread:$0]  (!%p2416_p13), %s2463_s13, 128, %s397_s0, %s386_s30  }
  0x50   : > { %p2764_p10 = scmp.ne.s32.totalorder %s2761_s18, 0 }
  0x51   : > { %s2490_s28 = sand.u32 (!%p2764_p10), 1, %s2256_s22   ;;  %p2765_p6 = scmp.ne.s32.totalorder (!%p2764_p10), %s2753_s14, 0 }
  0x52   : > { %405 = sbr.rel (%p2764_p10) target bundleno = 2428 (0x97c), region = 68  ;;  %s2493_s20 = sshll.u32 (!%p2764_p10), %s2490_s28, 3 }
  0x53   : > { %s408_s16 = scalar_lea.sflag (!%p2764_p10), [#allocation3], %s2490_s28  ;;  %s411_s19 = scalar_lea.vmem (!%p2764_p10), [#allocation2], %s2493_s20 }
  0x59   : > { %2239 = dma.done.wait (%p2765_p6), %s408_s16, 128  }
  0x5a   : > { %2241 = vsyncadd (%p2765_p6), %s408_s16, 4294967168  ;;  %s417_s0 = scalar_lea.sflag [#allocation6], %s2490_s28  ;;  %s420_s23 = scalar_lea.vmem [#allocation5], %s2493_s20 }
  0x5b   : > { %2243 = dma.done.wait (%p2765_p6), %s417_s0, 128  }
  0x5c   : > { %2245 = vsyncadd (%p2765_p6), %s417_s0, 4294967168  ;;  %v2268_v0 = vmov 0.0|0.0   ;;  %vm2269_vm0 = vmmov 0   ;;  %v2270_v1 = vmov 0.0   ;;  %v467_v2 = vld [vmem:[%s2727_s2] sm:$0xff]  ;;  %v468_v3 = vld [vmem:[%s2727_s2 + $0x8] sm:$0xff] }
  0x5d   : > { %2031 = vmatprep.subr.bf16.mxu0 %v2268_v0  ;;  %1938 = vmatprep.mubr.msk.f32.mxu0 %vm2269_vm0, %v2270_v1  ;;  %v469_v4 = vld [vmem:[%s2727_s2 + $0x10] sm:$0xff]  ;;  %v2032_v5 = vpack.c.bf16 %v468_v3, %v467_v2  ;;  %v470_v6 = vld [vmem:[%s2727_s2 + $0x18] sm:$0xff]  ;;  %v2526_v8 = vld [vmem:[%s411_s19] sm:$0xff]  ;;  %vm471_vm1 = vcmask 261120   ;;  %s2271_s27 = smov 104   ;;  %s2272_s16 = smov 120  }
  0x5e   : > { %1946 = vmatprep.subr.mxu1 %v2270_v1  ;;  %1948 = vmatprep.mubr.msk.f32.mxu1 %vm2269_vm0, %v2270_v1  ;;  %v2035_v7 = vpack.c.bf16 %v470_v6, %v469_v4  ;;  %s2273_s0 = smov 96   ;;  %s2274_s18 = smov 112   ;;  %vm555_vm2 = vcmask 64512   ;;  %v552_v20 = vld [vmem:[%s420_s23] sm:$0xff]  ;;  %v1206_v56 = vld [vmem:[%s2728_s3] sm:$0xff]  ;;  %v1207_v60 = vld [vmem:[%s2728_s3 + $0x8] sm:$0xff] }
  0x5f   : > { %2033 = vmatpush3.bf16.msra.mxu0 %v2032_v5  ;;  %s2275_s19 = smov 64   ;;  %v1209_v4 = vld [vmem:[%s2728_s3 + $0x18] sm:$0xff]  ;;  %vm1635_vm3 = vcmask 523264   ;;  %s1884_s17 = sshll.u32 %s2363_s25, 7 }
  0x60   : > { %2034 = vmatprep.subr.bf16.mxu0 %v2268_v0  ;;  %s465_s29 = scalar_lea.vmem [#allocation7], %s2493_s20  ;;  %p2766_p3 = scmp.ne.s32.totalorder %s2754_s15, 0 }
  0x61   : > { %s1754_s24 = sshll.u32 %s465_s29, 4  ;;  %s2276_s25 = smov [#allocation7]   ;;  %s2682_s24 = int_to_ptr.vmem [resolvable:$true] %s1754_s24 }
  0x62   : > { %s2198_s20 = sshll.u32 %s2276_s25, 4  ;;  %s2199_s20 = int_to_ptr.vmem [resolvable:$false] %s2198_s20 }
  0x63   : > { %2036 = vmatpush3.bf16.msra.mxu0 %v2035_v7  ;;  %s2200_s23 = scalar_lea.vmem %s2199_s20, 256  ;;  %p2201_p8 = scmp.lt.s32.totalorder %s2682_s24, %s2199_s20 }
  0x64   : > { %1941 = vmatprep.subr.mxu0 %v2270_v1 }
  0x66   : > { %1939 = vmatmul.mubr.msk.f32.vlgmr.msra.gmra.mrb[0].mxu0 %vm471_vm1, %v2526_v8 }
  0x67   : > { %1943 = vmatprep.mubr.msk.f32.mxu0 %vm2269_vm0, %v2270_v1 }
 0x139   : > { %v541_v9 = vpop.f32.mrb[0].mxu0 }
 0x13a   : > { %550 = vrot.lane.b32.xlu1 %v541_v9, %s2271_s27  ;;  %546 = vrot.lane.b32.xlu0 %v541_v9, %s2272_s16  ;;  %v1940_v10 = vpop.f32.mrb[1].mxu0 }
 0x13e   : > { %553 = vrot.lane.b32.xlu1 %v541_v9, %s2273_s0  ;;  %548 = vrot.lane.b32.xlu0 %v541_v9, %s2274_s18  ;;  %s1741_s18 = scalar_lea.sflag [#allocation4], %s2490_s28 }
 0x1ac   : > { %v551_v11 = vpop.permute.xlu1 %550  ;;  %v547_v12 = vpop.permute.xlu0 %546 }
 0x1ad   : > { %630 = vrot.lane.b32.xlu0 %v547_v12, %s2273_s0 }
 0x1b0   : > { %v554_v13 = vpop.permute.xlu1 %553  ;;  %v549_v14 = vpop.permute.xlu0 %548 }
 0x1b1   : > { %1942 = vmatpush3.xpose.msk.msra.mxu0 %vm555_vm2, %v554_v13  ;;  %782 = vrot.lane.b32.xlu0 %v551_v11, %s2273_s0  ;;  %v1208_v13 = vld [vmem:[%s2728_s3 + $0x10] sm:$0xff] }
 0x1b2   : > { %706 = vrot.lane.b32.xlu1 %v549_v14, %s2273_s0  ;;  %1951 = vmatprep.subr.mxu0 %v2270_v1  ;;  %s2680_s0 = scalar_lea.hbm %s2737_s12, %s1884_s17 }
 0x1b4   : > { %1944 = vmatmul.mubr.msk.f32.vlgmr.msra.gmra.mrb[2].mxu0 %vm555_vm2, %v541_v9 }
 0x1b5   : > { %894 = vrot.lane.b32.xlu0 %v541_v9, %s2275_s19  ;;  %1953 = vmatprep.mubr.msk.f32.mxu0 %vm2269_vm0, %v2270_v1 }
 0x1b6   : > { %970 = vrot.lane.b32.xlu1 %v547_v12, %s2275_s19 }
 0x21f   : > { %v631_v15 = vpop.permute.xlu0 %630 }
 0x220   : > { %1947 = vmatpush3.xpose.msk.msra.mxu1 %vm555_vm2, %v631_v15 }
 0x221   : > { %1956 = vmatprep.subr.mxu1 %v2270_v1 }
 0x223   : > { %1949 = vmatmul.mubr.msk.f32.vlgmr.msra.gmra.mrb[0].mxu1 %vm555_vm2, %v547_v12  ;;  %v783_v16 = vpop.permute.xlu0 %782 }
 0x224   : > { %v707_v17 = vpop.permute.xlu1 %706  ;;  %1957 = vmatpush3.xpose.msk.msra.mxu1 %vm555_vm2, %v783_v16  ;;  %1958 = vmatprep.mubr.msk.f32.mxu1 %vm2269_vm0, %v2270_v1 }
 0x225   : > { %1952 = vmatpush3.xpose.msk.msra.mxu0 %vm555_vm2, %v707_v17  ;;  %1966 = vmatprep.subr.mxu1 %v2270_v1 }
 0x226   : > { %1961 = vmatprep.subr.mxu0 %v2270_v1 }
 0x227   : > { %1959 = vmatmul.mubr.msk.f32.vlgmr.msra.gmra.mrb[2].mxu1 %vm555_vm2, %v551_v11  ;;  %v895_v18 = vpop.permute.xlu0 %894 }
 0x228   : > { %1954 = vmatmul.mubr.msk.f32.vlgmr.msra.gmra.mrb[4].mxu0 %vm555_vm2, %v549_v14  ;;  %v971_v19 = vpop.permute.xlu1 %970  ;;  %1968 = vmatprep.mubr.msk.f32.mxu1 %vm2269_vm0, %v2270_v1 }
 0x229   : > { %1962 = vmatpush3.msra.mxu0 %v895_v18  ;;  %1967 = vmatpush3.msra.mxu1 %v971_v19 }
 0x22a   : > { %1963 = vmatprep.mubr.msk.f32.mxu0 %vm2269_vm0, %v2270_v1  ;;  %1971 = vmatprep.subr.mxu0 %v2270_v1 }
 0x22b   : > { %1976 = vmatprep.subr.mxu1 %v2270_v1 }
 0x287   : > { %v626_v21 = vpop.f32.mrb[2].mxu0 }
 0x288   : > { %v627_v22 = vadd.f32 %v626_v21, %v552_v20  ;;  %v1945_v23 = vpop.f32.mrb[3].mxu0 }
 0x28a   : > { %v858_v24 = vsel %vm555_vm2, %v627_v22, -inf }
 0x28b   : > { %859 = vmax.xlane.f32.xlu1 %v858_v24 }
 0x2f6   : > { %v702_v25 = vpop.f32.mrb[0].mxu1 }
 0x2f7   : > { %v703_v26 = vadd.f32 %v702_v25, %v552_v20  ;;  %v1950_v27 = vpop.f32.mrb[1].mxu1 }
 0x2f9   : > { %v861_v28 = vsel %vm555_vm2, %v703_v26, -inf }
 0x2fa   : > { %862 = vmax.xlane.f32.xlu0 %v861_v28  ;;  %v854_v29 = vpop.f32.mrb[2].mxu1 }
 0x2fb   : > { %v778_v30 = vpop.f32.mrb[4].mxu0  ;;  %v855_v31 = vadd.f32 %v854_v29, %v552_v20  ;;  %v1960_v32 = vpop.f32.mrb[3].mxu1 }
 0x2fc   : > { %v779_v33 = vadd.f32 %v778_v30, %v552_v20  ;;  %v1955_v34 = vpop.f32.mrb[5].mxu0 }
 0x2fd   : > { %v867_v35 = vsel %vm555_vm2, %v855_v31, -inf }
 0x2fe   : > { %868 = vmax.xlane.f32.xlu1 %v867_v35  ;;  %v864_v36 = vsel %vm555_vm2, %v779_v33, -inf }
 0x2ff   : > { %865 = vmax.xlane.f32.xlu0 %v864_v36 }
 0x30f   : > { %1046 = vrot.lane.b32.xlu1 %v549_v14, %s2275_s19 }
 0x315   : > { %1122 = vrot.lane.b32.xlu0 %v551_v11, %s2275_s19  ;;  %s2194_s19 = scalar_lea.vmem %s2682_s24, 128 }
 0x316   : > { %p2195_p13 = scmp.ne.s32.totalorder %s2682_s24, %s2194_s19  ;;  %p2202_p9 = scmp.lt.s32.totalorder %s2200_s23, %s2194_s19 }
 0x318   : > { %v860_v37 = vpop.xlane.xlu1 %859  ;;  %p2196_p7 = pnand %p2195_p13, %p2766_p3  ;;  %p2203_p0 = por %p2202_p9, %p2201_p8 }
 0x319   : > { %v870_v38 = vsub.f32 %v627_v22, %v860_v37 }
 0x31a   : > { %p2197_p5 = pneg %p2196_p7 }
 0x31b   : > { %v874_v39 = vmul.f32 1.442695, %v870_v38 }
 0x31c   : > { %p2204_p1 = pnand %p2203_p0, %p2197_p5 }
 0x31d   : > { %2114 = vpow2.f32 %v874_v39  ;;  %v1535_v39 = vld [vmem:[%s2729_s4] sm:$0xff] }
 0x327   : > { %v2115_v40 = vpop.eup %2114 }
 0x328   : > { %1964 = vmatmul.mubr.msk.f32.vlgmr.msra.gmra.mrb[6].mxu0 %vm555_vm2, %v2115_v40  ;;  %v882_v41 = vsel %vm555_vm2, %v2115_v40, 0.0  ;;  %v1536_v40 = vld [vmem:[%s2729_s4 + $0x8] sm:$0xff] }
 0x329   : > { %1973 = vmatprep.mubr.msk.f32.mxu0 %vm2269_vm0, %v2270_v1 }
 0x334   : > { %883 = vadd.xlane.f32.xlu0 %v882_v41  ;;  %v2038_v41 = vpack.c.bf16 %v1536_v40, %v1535_v39 }
 0x387   : > { %v863_v42 = vpop.xlane.xlu0 %862 }
 0x388   : > { %v871_v43 = vsub.f32 %v703_v26, %v863_v42  ;;  %v1538_v42 = vld [vmem:[%s2729_s4 + $0x18] sm:$0xff] }
 0x38a   : > { %v876_v44 = vmul.f32 1.442695, %v871_v43 }
 0x38b   : > { %v869_v45 = vpop.xlane.xlu1 %868 }
 0x38c   : > { %2116 = vpow2.f32 %v876_v44  ;;  %v873_v46 = vsub.f32 %v855_v31, %v869_v45  ;;  %v866_v47 = vpop.xlane.xlu0 %865  ;;  %v1620_v44 = vld [vmem:[%s2731_s6] sm:$0xff]  ;;  %v1621_v45 = vld [vmem:[%s2731_s6 + $0x8] sm:$0xff] }
 0x38d   : > { %v872_v48 = vsub.f32 %v779_v33, %v866_v47  ;;  %v2044_v47 = vpack.c.bf16 %v1621_v45, %v1620_v44 }
 0x38e   : > { %v880_v49 = vmul.f32 1.442695, %v873_v46  ;;  %v1622_v46 = vld [vmem:[%s2731_s6 + $0x10] sm:$0xff] }
 0x38f   : > { %v878_v50 = vmul.f32 1.442695, %v872_v48  ;;  %v1047_v51 = vpop.permute.xlu1 %1046  ;;  %v1623_v48 = vld [vmem:[%s2731_s6 + $0x18] sm:$0xff] }
 0x390   : > { %2118 = vpow2.f32 %v880_v49  ;;  %1972 = vmatpush3.msra.mxu0 %v1047_v51  ;;  %v1123_v53 = vpop.permute.xlu0 %1122  ;;  %v2047_v49 = vpack.c.bf16 %v1623_v48, %v1622_v46  ;;  %v1625_v51 = vld [vmem:[%s2731_s6 + $0x28] sm:$0xff] }
 0x391   : > { %2120 = vpow2.f32 %v878_v50  ;;  %1981 = vmatprep.subr.mxu0 %v2270_v1  ;;  %v1624_v50 = vld [vmem:[%s2731_s6 + $0x20] sm:$0xff] }
 0x396   : > { %v2117_v52 = vpop.eup %2116 }
 0x397   : > { %1969 = vmatmul.mubr.msk.f32.vlgmr.msra.gmra.mrb[4].mxu1 %vm555_vm2, %v2117_v52  ;;  %v885_v54 = vsel %vm555_vm2, %v2117_v52, 0.0  ;;  %v2050_v52 = vpack.c.bf16 %v1625_v51, %v1624_v50 }
 0x398   : > { %1977 = vmatpush3.msra.mxu1 %v1123_v53  ;;  %886 = vadd.xlane.f32.xlu1 %v885_v54 }
 0x399   : > { %1978 = vmatprep.mubr.msk.f32.mxu1 %vm2269_vm0, %v2270_v1  ;;  %1986 = vmatprep.subr.mxu1 %v2270_v1 }
 0x39a   : > { %v2119_v55 = vpop.eup %2118 }
 0x39b   : > { %v2121_v57 = vpop.eup %2120  ;;  %1979 = vmatmul.mubr.msk.f32.vlgmr.msra.gmra.mrb[6].mxu1 %vm555_vm2, %v2119_v55  ;;  %v891_v58 = vsel %vm555_vm2, %v2119_v55, 0.0 }
 0x39c   : > { %1974 = vmatmul.mubr.msk.f32.vlgmr.msra.gmra.mrb[8].mxu0 %vm555_vm2, %v2121_v57  ;;  %892 = vadd.xlane.f32.xlu1 %v891_v58  ;;  %v888_v59 = vsel %vm555_vm2, %v2121_v57, 0.0  ;;  %v1875_v57 = vld [vmem:[%s2733_s8] ss:$0 sm:$0xff] }
 0x39d   : > { %889 = vadd.xlane.f32.xlu0 %v888_v59  ;;  %1987 = vmatpush3.msra.mxu1 %v1206_v56  ;;  %v1876_v59 = vld [vmem:[%s2734_s9] ss:$0 sm:$0xff] }
 0x39e   : > { %1988 = vmatprep.mubr.msk.f32.mxu1 %vm2269_vm0, %v2270_v1  ;;  %1983 = vmatprep.mubr.msk.f32.mxu0 %vm2269_vm0, %v2270_v1 }
 0x39f   : > { %1996 = vmatprep.subr.mxu1 %v2270_v1  ;;  %1982 = vmatpush3.msra.mxu0 %v1207_v60 }
 0x3a0   : > { %1991 = vmatprep.subr.mxu0 %v2270_v1 }
 0x3c1   : > { %v884_v61 = vpop.xlane.xlu0 %883 }
 0x3c2   : > { %2122 = vrcp.f32 %v884_v61 }
 0x3cc   : > { %v2123_v62 = vpop.eup %2122 }
 0x3fb   : > { %v966_v63 = vpop.f32.mrb[6].mxu0 }
 0x3fc   : > { %v1202_v2 = vmul.f32 %v2123_v62, %v966_v63  ;;  %v1965_v3 = vpop.f32.mrb[7].mxu0  ;;  %v1627_v62 = vld [vmem:[%s2731_s6 + $0x38] sm:$0xff] }
 0x3fe   : > { %1989 = vmatmul.mubr.msk.f32.vlgmr.msra.gmra.mrb[8].mxu1 %vm555_vm2, %v1202_v2  ;;  %v1877_v2 = vld [vmem:[%s2730_s5] ss:$0 sm:$0xff] }
 0x3ff   : > { %1997 = vmatpush3.msra.mxu1 %v1209_v4  ;;  %1998 = vmatprep.mubr.msk.f32.mxu1 %vm2269_vm0, %v2270_v1 }
 0x400   : > { %2043 = vmatprep.subr.bf16.mxu1 %v2268_v0 }
 0x425   : > { %v887_v5 = vpop.xlane.xlu1 %886 }
 0x426   : > { %2124 = vrcp.f32 %v887_v5 }
 0x429   : > { %v893_v6 = vpop.xlane.xlu1 %892 }
 0x42a   : > { %v890_v7 = vpop.xlane.xlu0 %889  ;;  %2126 = vrcp.f32 %v893_v6 }
 0x42b   : > { %2128 = vrcp.f32 %v890_v7  ;;  %v1879_v7 = vld [vmem:[%s2732_s7] ss:$0 sm:$0xff] }
 0x430   : > { %v2125_v9 = vpop.eup %2124 }
 0x434   : > { %v2127_v14 = vpop.eup %2126 }
 0x435   : > { %v2129_v16 = vpop.eup %2128 }
 0x46a   : > { %v1042_v10 = vpop.f32.mrb[4].mxu1 }
 0x46b   : > { %v1203_v11 = vmul.f32 %v2125_v9, %v1042_v10  ;;  %v1970_v12 = vpop.f32.mrb[5].mxu1 }
 0x46d   : > { %1984 = vmatmul.mubr.msk.f32.vlgmr.msra.gmra.mrb[10].mxu0 %vm555_vm2, %v1203_v11 }
 0x46e   : > { %v1194_v15 = vpop.f32.mrb[6].mxu1  ;;  %1992 = vmatpush3.msra.mxu0 %v1208_v13  ;;  %1993 = vmatprep.mubr.msk.f32.mxu0 %vm2269_vm0, %v2270_v1 }
 0x46f   : > { %v1118_v17 = vpop.f32.mrb[8].mxu0  ;;  %v1205_v18 = vmul.f32 %v2127_v14, %v1194_v15  ;;  %v1980_v19 = vpop.f32.mrb[7].mxu1  ;;  %2037 = vmatprep.subr.bf16.mxu0 %v2268_v0 }
 0x470   : > { %v1204_v20 = vmul.f32 %v2129_v16, %v1118_v17  ;;  %v1975_v21 = vpop.f32.mrb[9].mxu0 }
 0x471   : > { %1999 = vmatmul.mubr.msk.f32.vlgmr.msra.gmra.mrb[10].mxu1 %vm555_vm2, %v1205_v18 }
 0x472   : > { %1994 = vmatmul.mubr.msk.f32.vlgmr.msra.gmra.mrb[12].mxu0 %vm555_vm2, %v1204_v20  ;;  %2028 = vmatprep.mubr.msk.f32.mxu1 %vm2269_vm0, %v2270_v1 }
 0x473   : > { %2009 = vmatprep.mubr.msk.f32.mxu0 %vm2269_vm0, %v2270_v1  ;;  %2039 = vmatpush3.bf16.msra.mxu0 %v2038_v41 }
 0x474   : > { %2040 = vmatprep.subr.bf16.mxu0 %v2268_v0  ;;  %2045 = vmatpush3.bf16.msra.mxu1 %v2044_v47 }
 0x475   : > { %2046 = vmatprep.subr.bf16.mxu1 %v2268_v0 }
 0x478   : > { %2048 = vmatpush3.bf16.msra.mxu1 %v2047_v49 }
 0x479   : > { %2049 = vmatprep.subr.bf16.mxu1 %v2268_v0 }
 0x47c   : > { %2051 = vmatpush3.bf16.msra.mxu1 %v2050_v52 }
 0x47d   : > { %2052 = vmatprep.subr.bf16.mxu1 %v2268_v0  ;;  %v1626_v0 = vld [vmem:[%s2731_s6 + $0x30] sm:$0xff] }
 0x47e   : > { %v2053_v63 = vpack.c.bf16 %v1627_v62, %v1626_v0 }
 0x480   : > { %2054 = vmatpush3.bf16.msra.mxu1 %v2053_v63 }
 0x4d1   : > { %v1352_v22 = vpop.f32.mrb[8].mxu1 }
 0x4d2   : > { %v1990_v23 = vpop.f32.mrb[9].mxu1 }
 0x4d3   : > { %v1881_v23 = vld [vmem:[%s2735_s10] ss:$0 sm:$0xff] }
 0x540   : > { %v1279_v24 = vpop.f32.mrb[10].mxu0 }
 0x541   : > { %v1353_v25 = vadd.f32 %v1352_v22, %v1279_v24  ;;  %v1985_v26 = vpop.f32.mrb[11].mxu0 }
 0x544   : > { %v1499_v27 = vpop.f32.mrb[10].mxu1 }
 0x545   : > { %v1425_v28 = vpop.f32.mrb[12].mxu0  ;;  %v2000_v29 = vpop.f32.mrb[11].mxu1 }
 0x546   : > { %v1429_v30 = vadd.f32 %v1425_v28, %v1353_v25  ;;  %v1995_v31 = vpop.f32.mrb[13].mxu0  ;;  %v1882_v25 = vld [vmem:[%s2736_s11] ss:$0 sm:$0xff] }
 0x548   : > { %v1503_v32 = vadd.f32 %v1499_v27, %v1429_v30 }
 0x54a   : > { %v1504_v33 = vadd.f32 %v1503_v32, %v2526_v8  ;;  %v1537_v8 = vld [vmem:[%s2729_s4 + $0x10] sm:$0xff] }
 0x54b   : > { %v2041_v43 = vpack.c.bf16 %v1538_v42, %v1537_v8 }
 0x54c   : > { %v1507_v34 = vsel %vm471_vm1, %v1504_v33, 0.0 }
 0x54d   : > { %1508 = vadd.xlane.f32.xlu0 %v1507_v34  ;;  %2042 = vmatpush3.bf16.msra.mxu0 %v2041_v43 }
 0x5da   : > { %v1509_v35 = vpop.xlane.xlu0 %1508 }
 0x5db   : > { %v1511_v36 = vmul.f32 0.03125, %v1509_v35 }
 0x5dd   : > { %v1512_v37 = vsub.f32 %v1504_v33, %v1511_v36 }
 0x5df   : > { %v1513_v1 = vmul.f32 %v1512_v37, %v1512_v37 }
 0x5e1   : > { %v1514_v38 = vsel %vm471_vm1, %v1513_v1, 0.0 }
 0x5e2   : > { %1515 = vadd.xlane.f32.xlu1 %v1514_v38 }
 0x66f   : > { %v1516_v53 = vpop.xlane.xlu1 %1515 }
 0x670   : > { %v1517_v54 = vmul.f32 0.03125, %v1516_v53 }
 0x672   : > { %v1518_v55 = vadd.f32 1e-06, %v1517_v54 }
 0x674   : > { %2130 = vrsqrt.f32 %v1518_v55 }
 0x67e   : > { %v2131_v56 = vpop.eup %2130 }
 0x67f   : > { %v1520_v58 = vmul.f32 %v2131_v56, %v1512_v37 }
 0x681   : > { %v1527_v60 = vmul.f32 %v1875_v57, %v1520_v58 }
 0x683   : > { %v1534_v61 = vadd.f32 %v1876_v59, %v1527_v60 }
 0x685   : > { %2010 = vmatmul.mubr.msk.f32.vlgmr.msra.gmra.mrb[14].mxu0 %vm471_vm1, %v1534_v61 }
 0x758   : > { %v1615_v3 = vpop.f32.mrb[14].mxu0 }
 0x759   : > { %v1616_v4 = vadd.f32 %v1877_v2, %v1615_v3  ;;  %v2011_v5 = vpop.f32.mrb[15].mxu0 }
 0x75b   : > { %v1619_v6 = vmax.f32 %v1616_v4, 0.0 }
 0x75d   : > { %2029 = vmatmul.mubr.msk.f32.vlgmr.msra.gmra.mrb[12].mxu1 %vm1635_vm3, %v1619_v6 }
 0x830   : > { %v1705_v9 = vpop.f32.mrb[12].mxu1 }
 0x831   : > { %v1706_v10 = vadd.f32 %v1879_v7, %v1705_v9  ;;  %v2030_v11 = vpop.f32.mrb[13].mxu1 }
 0x833   : > { %v1709_v12 = vadd.f32 %v1706_v10, %v1534_v61 }
 0x835   : > { %v1712_v13 = vsel %vm471_vm1, %v1709_v12, 0.0 }
 0x836   : > { %1713 = vadd.xlane.f32.xlu0 %v1712_v13 }
 0x8c3   : > { %v1714_v14 = vpop.xlane.xlu0 %1713 }
 0x8c4   : > { %v1715_v15 = vmul.f32 0.03125, %v1714_v14 }
 0x8c6   : > { %v1716_v16 = vsub.f32 %v1709_v12, %v1715_v15 }
 0x8c8   : > { %v1717_v17 = vmul.f32 %v1716_v16, %v1716_v16 }
 0x8ca   : > { %v1718_v18 = vsel %vm471_vm1, %v1717_v17, 0.0 }
 0x8cb   : > { %1719 = vadd.xlane.f32.xlu1 %v1718_v18 }
 0x958   : > { %v1720_v19 = vpop.xlane.xlu1 %1719 }
 0x959   : > { %v1721_v20 = vmul.f32 0.03125, %v1720_v19 }
 0x95b   : > { %v1722_v21 = vadd.f32 1e-06, %v1721_v20 }
 0x95d   : > { %2132 = vrsqrt.f32 %v1722_v21 }
 0x967   : > { %v2133_v22 = vpop.eup %2132 }
 0x968   : > { %v1724_v24 = vmul.f32 %v2133_v22, %v1716_v16 }
 0x96a   : > { %v1731_v26 = vmul.f32 %v1881_v23, %v1724_v24 }
 0x96c   : > { %v1738_v27 = vadd.f32 %v1882_v25, %v1731_v26 }
 0x96e   : > { %1739 = vst.msk [vmem:[%s465_s29] sm:$0xff] %vm471_vm1, %v1738_v27 }
 0x96f   : > { %2207 = shalt.err (!%p2204_p1)
}
 0x970   : > { %s2208_s28 = scalar_lea.hbm %s2680_s0, 128  ;;  %s2212_s14 = scalar_lea.hbm %s2737_s12, 256 }
 0x971   : > { %p2209_p11 = scmp.ne.s32.totalorder %s2680_s0, %s2208_s28  ;;  %p2213_p4 = scmp.lt.u32.totalorder %s2680_s0, %s2737_s12 }
 0x972   : > { %p2214_p10 = scmp.lt.u32.totalorder %s2212_s14, %s2208_s28  ;;  %p2216_p13 = scmp.lt.u32.totalorder %s2208_s28, %s2680_s0 }
 0x973   : > { %p2210_p12 = pnand %p2209_p11, %p2766_p3 }
 0x974   : > { %p2215_p6 = por %p2214_p10, %p2213_p4 }
 0x975   : > { %p2211_p2 = pneg %p2210_p12 }
 0x976   : > { %p2217_p7 = por %p2216_p13, %p2215_p6 }
 0x978   : > { %p2218_p5 = pnand %p2217_p7, %p2211_p2 }
 0x97a   : > { %2221 = shalt.err (!%p2218_p5)
}
 0x97b   : > { %2059 = dma.vmem_to_hbm [thread:$0]  (%p2766_p3), %s2682_s24, 128, %s2680_s0, %s1741_s18  }
 0x97c PF: > { %s2767_s29 = sld [smem:[#allocation15_spill]]  ;;  %s2768_s27 = sld [smem:[#allocation12_spill]] }
 0x97d   : > { %s1766_s16 = sand.u32 1, %s2252_s21  }
 0x97e   : > { %s1767_s19 = scalar_lea.sflag [#allocation4], %s1766_s16 }
 0x982   : > { %p2769_p8 = scmp.ne.s32.totalorder %s2767_s29, 0  ;;  %p2770_p9 = scmp.ge.s32.totalorder %s2768_s27, 2 }
 0x984   : > { %p2069_p0 = pnand %p2770_p9, %p2769_p8 }
 0x986   : > { %2247 = dma.done.wait (!%p2069_p0), %s1767_s19, 128  }
 0x987   : > { %2249 = vsyncadd (!%p2069_p0), %s1767_s19, 4294967168  ;;  %s2771_s24 = sld [smem:[#allocation13_spill]]  ;;  %s2772_s25 = sld [smem:[#allocation11_spill]] }
 0x988   : > { %s2773_s23 = sld [smem:[#allocation14_spill]]  ;;  %s2774_s21 = smov %s2256_s22 }
 0x98d   : > { %p28_p1 = scmp.ge.s32.totalorder %s2771_s24, 4   ;;  %s2775_s22 = smov %s2772_s25 }
 0x98f   :  { %30 = sbr.rel (!%p28_p1) target bundleno = 9 (0x9), region = 126 }
 0x996   :  { %1772 = vsyncpa [#allocation3], 1 }
 0x997   :  { %1774 = vsyncpa [#allocation3 + $0x1], 1 }
 0x998   :  { %1775 = vsyncpa [#allocation6], 1 }
 0x999   :  { %1777 = vsyncpa [#allocation6 + $0x1], 1 }
 0x99a   :  { %1778 = vsyncpa [#allocation4], 1 }
 0x99b   :  { %1780 = vsyncpa [#allocation4 + $0x1], 1 }

</bundles_post_ra>
